<compile_context>
chip_gen: v6e
topology: v6e:2x2x1
jax: 0.10.0
libtpu: 0.0.40
codegen_flags: <defaults>
</compile_context>

<pallas_src>
import jax
import jax.numpy as jnp
from jax.experimental import pallas as pl
from jax.experimental.pallas import tpu as pltpu


def _gru_kernel(ids_ref, emb_hbm, w_ih_ref, w_hh_ref, b_ih_ref, b_hh_ref, h_ref,
                h_f32_ref, h_bf16_ref, x_scratch, gather_sem):
    """Embedding DMA-gather + single-step GRU cell (PyTorch gate order [r, z, n])."""
    B = x_scratch.shape[0]
    H = h_ref.shape[1]

    # Issue one row-gather DMA per (padded) batch element.  Token id 0 hits the zeroed
    # row -> padding_idx=0 semantics preserved.  Scalar (SMEM) id reads all happen
    # before any DMA wait.
    copies = []
    for b in range(B):
        cp = pltpu.make_async_copy(emb_hbm.at[pl.ds(ids_ref[b], 1), :],
                                   x_scratch.at[pl.ds(b, 1), :],
                                   gather_sem.at[b])
        cp.start()
        copies.append(cp)

    # Hide the gather latency: the h-side gate matmul does not depend on x, so run it
    # while the row DMAs are in flight.  One fused (B,H)x(H,3H) bf16 MXU push, f32 acc.
    h = h_ref[...]                                                    # (B, H) f32
    gh = jnp.dot(h.astype(jnp.bfloat16), w_hh_ref[...],
                 preferred_element_type=jnp.float32) + b_hh_ref[...]  # (B, 3H) f32

    for cp in copies:
        cp.wait()

    x = x_scratch[...].astype(jnp.bfloat16)                           # (B, E)
    gi = jnp.dot(x, w_ih_ref[...],
                 preferred_element_type=jnp.float32) + b_ih_ref[...]  # (B, 3H) f32

    # Gate slices at lane-aligned offsets (H is a multiple of 128).  Order [r, z, n].
    gi_r, gi_z, gi_n = gi[:, 0:H], gi[:, H:2 * H], gi[:, 2 * H:3 * H]
    gh_r, gh_z, gh_n = gh[:, 0:H], gh[:, H:2 * H], gh[:, 2 * H:3 * H]

    r = jax.nn.sigmoid(gi_r + gh_r)
    z = jax.nn.sigmoid(gi_z + gh_z)
    n = jnp.tanh(gi_n + r * gh_n)
    h_new = (1.0 - z) * n + z * h

    h_f32_ref[...] = h_new
    h_bf16_ref[...] = h_new.astype(jnp.bfloat16)


def _logits_kernel(h_ref, w_ref, scale_ref, b_ref, pred_ref):
    """One (Bp, TN) tile of (h_new @ w_out) * scale + b_out.

    w_ref is an int8 tile; int8 values are exact in bf16, so dequantizing the streamed
    tile to bf16 and letting the MXU accumulate in f32 keeps accuracy while halving the
    dominant HBM stream (and never relies on an int MXU path -> v7x-safe)."""
    w = w_ref[...].astype(jnp.bfloat16)
    acc = jnp.dot(h_ref[...], w, preferred_element_type=jnp.float32)
    pred_ref[...] = acc * scale_ref[...] + b_ref[...]


def _round_up(x, m):
    return -(-x // m) * m


def _pick_vocab_tile(vp):
    # Largest lane-aligned tile that still leaves >= 2 (preferably an even number of)
    # grid steps so the "parallel" vocab axis can feed both v7x TensorCores.
    for tn in (2048, 1024, 512, 256, 128):
        if vp % tn == 0 and (vp // tn) >= 2 and (vp // tn) % 2 == 0:
            return tn
    for tn in (2048, 1024, 512, 256, 128):
        if vp % tn == 0 and (vp // tn) >= 2:
            return tn
    return vp  # tiny vocab: single tile


def decoder_forward(x_ids, hidden, params):
    """x_ids: (B,) int tokens; hidden: (1, B, H) f32.  Returns (pred (B, V), hidden (1, B, H))."""
    B = x_ids.shape[0]
    E = params["emb"].shape[1]
    H = params["w_hh"].shape[0]
    V = params["w_out"].shape[1]
    assert E % 128 == 0 and H % 128 == 0, "E and H must be lane-aligned (multiples of 128)"

    Bp = _round_up(B, 8)      # f32 sublane alignment
    Vp = _round_up(V, 128)    # lane alignment

    ids_p = jnp.zeros((Bp,), jnp.int32).at[:B].set(x_ids.astype(jnp.int32))
    h0_p = jnp.zeros((Bp, H), jnp.float32).at[:B].set(hidden[0])

    vmem = pl.BlockSpec(memory_space=pltpu.MemorySpace.VMEM)

    # ---- kernel 1: embedding gather + GRU cell (runs exactly once) ----------------
    h_f32, h_bf16 = pl.pallas_call(
        _gru_kernel,
        out_shape=(jax.ShapeDtypeStruct((Bp, H), jnp.float32),
                   jax.ShapeDtypeStruct((Bp, H), jnp.bfloat16)),
        in_specs=[
            pl.BlockSpec(memory_space=pltpu.MemorySpace.SMEM),  # token ids as SMEM scalars
            pl.BlockSpec(memory_space=pl.ANY),                  # embedding table stays in HBM
            vmem, vmem, vmem, vmem, vmem,                       # GRU weights/biases, h0
        ],
        out_specs=(vmem, vmem),
        scratch_shapes=[pltpu.VMEM((Bp, E), params["emb"].dtype),
                        pltpu.SemaphoreType.DMA((Bp,))],
    )(ids_p, params["emb"], params["w_ih"], params["w_hh"],
      params["b_ih"], params["b_hh"], h0_p)

    # ---- kernel 2: vocab-tiled logits projection -----------------------------------
    w_out_p = jnp.pad(params["w_out"], ((0, 0), (0, Vp - V)))
    scale_p = jnp.pad(params["w_scale"], ((0, 0), (0, Vp - V)), constant_values=1.0)
    b_out_p = jnp.pad(params["b_out"], ((0, 0), (0, Vp - V)))

    TN = _pick_vocab_tile(Vp)
    # Per-step VMEM footprint (resident h + double-buffered int8 w / scale / bias / pred
    # streams) is tiny even at TN=2048; keep a conservative explicit cap anyway.
    tile_bytes = Bp * H * 2 + 2 * (H * TN * 1 + 2 * TN * 4 + Bp * TN * 4)
    vmem_limit = int(min(48 * 1024 * 1024, max(16 * 1024 * 1024, 4 * tile_bytes)))

    pred_p = pl.pallas_call(
        _logits_kernel,
        out_shape=jax.ShapeDtypeStruct((Bp, Vp), jnp.float32),
        grid=(Vp // TN,),
        in_specs=[
            pl.BlockSpec((Bp, H), lambda j: (0, 0)),   # h_new stays VMEM-resident
            pl.BlockSpec((H, TN), lambda j: (0, j)),   # stream int8 w_out tiles
            pl.BlockSpec((1, TN), lambda j: (0, j)),   # per-column dequant scales
            pl.BlockSpec((1, TN), lambda j: (0, j)),   # bias
        ],
        out_specs=pl.BlockSpec((Bp, TN), lambda j: (0, j)),
        compiler_params=pltpu.CompilerParams(
            dimension_semantics=("parallel",),          # shards vocab tiles across v7x's 2 TCs
            vmem_limit_bytes=vmem_limit),
    )(h_bf16, w_out_p, scale_p, b_out_p)

    return pred_p[:B, :V], h_f32[:B][None]


def init_params(key, output_size, embed_size, hidden_size):
    k = jax.random.split(key, 7)
    emb = 0.1 * jax.random.normal(k[0], (output_size, embed_size), jnp.float32)
    emb = emb.at[0].set(0.0)                                   # padding_idx = 0
    # GRU weights in x @ W layout, all three gates fused on the last axis, order [r, z, n].
    # Stored in bf16 (matmul inputs); biases stay f32.
    w_ih = (0.1 * jax.random.normal(k[1], (embed_size, 3 * hidden_size), jnp.float32)
            ).astype(jnp.bfloat16)
    w_hh = (0.1 * jax.random.normal(k[2], (hidden_size, 3 * hidden_size), jnp.float32)
            ).astype(jnp.bfloat16)
    b_ih = 0.1 * jax.random.normal(k[3], (1, 3 * hidden_size), jnp.float32)
    b_hh = 0.1 * jax.random.normal(k[4], (1, 3 * hidden_size), jnp.float32)
    # Output projection: int8 weights + per-column f32 scales (halves the dominant HBM
    # stream of the vocab projection on every TPU generation).
    w_out_f32 = 0.1 * jax.random.normal(k[5], (hidden_size, output_size), jnp.float32)
    w_scale = jnp.maximum(jnp.max(jnp.abs(w_out_f32), axis=0, keepdims=True), 1e-12) / 127.0
    w_out = jnp.clip(jnp.round(w_out_f32 / w_scale), -127, 127).astype(jnp.int8)
    b_out = 0.1 * jax.random.normal(k[6], (1, output_size), jnp.float32)
    return dict(emb=emb, w_ih=w_ih, w_hh=w_hh, b_ih=b_ih, b_hh=b_hh,
                w_out=w_out, w_scale=w_scale, b_out=b_out)


def decoder_reference(x_ids, hidden, params):
    """Pure-JAX reference mirroring the kernel math exactly: bf16 matmul inputs with f32
    accumulation, PyTorch GRU gate order [r, z, n], int8 w_out dequantized per column."""
    def bdot(a, b):
        return jnp.dot(a.astype(jnp.bfloat16), b.astype(jnp.bfloat16),
                       preferred_element_type=jnp.float32)

    H = params["w_hh"].shape[0]
    x = params["emb"][x_ids]                                   # (B, E) f32, row 0 is zero
    h = hidden[0]
    gi = bdot(x, params["w_ih"]) + params["b_ih"]
    gh = bdot(h, params["w_hh"]) + params["b_hh"]
    r = jax.nn.sigmoid(gi[:, :H] + gh[:, :H])
    z = jax.nn.sigmoid(gi[:, H:2 * H] + gh[:, H:2 * H])
    n = jnp.tanh(gi[:, 2 * H:] + r * gh[:, 2 * H:])
    h_new = (1.0 - z) * n + z * h
    pred = bdot(h_new, params["w_out"]) * params["w_scale"] + params["b_out"]
    return pred, h_new[None]


if __name__ == "__main__":
    output_size = 500    # vocab size (not a multiple of 128 -> exercises vocab padding)
    embed_size = 128
    hidden_size = 128
    batch = 4            # padded to 8 inside the wrapper

    key = jax.random.PRNGKey(0)
    kp, kx, kh = jax.random.split(key, 3)
    params = init_params(kp, output_size, embed_size, hidden_size)

    x_ids = jax.random.randint(kx, (batch,), 0, output_size, dtype=jnp.int32)
    hidden = 0.1 * jax.random.normal(kh, (1, batch, hidden_size), jnp.float32)

    pred, h_new = jax.jit(decoder_forward)(x_ids, hidden, params)
    pred = jax.block_until_ready(pred)
    h_new = jax.block_until_ready(h_new)

    pred_ref, h_ref = decoder_reference(x_ids, hidden, params)
    assert pred.shape == (batch, output_size)
    assert h_new.shape == (1, batch, hidden_size)
    assert jnp.allclose(h_new, h_ref, atol=2e-4, rtol=2e-3), "hidden mismatch"
    assert jnp.allclose(pred, pred_ref, atol=2e-3, rtol=2e-3), "prediction mismatch"

    print("KERNEL_OK")
</pallas_src>

<mosaic_0001>
module attributes {stable_mosaic.version = 11 : i64} {
  func.func @_gru_kernel(%arg0: memref<8xi32, #tpu.memory_space<smem>>, %arg1: memref<500x128xf32, #tpu.memory_space<any>>, %arg2: memref<128x384xbf16, #tpu.memory_space<vmem>>, %arg3: memref<128x384xbf16, #tpu.memory_space<vmem>>, %arg4: memref<1x384xf32, #tpu.memory_space<vmem>>, %arg5: memref<1x384xf32, #tpu.memory_space<vmem>>, %arg6: memref<8x128xf32, #tpu.memory_space<vmem>>, %arg7: memref<8x128xf32, #tpu.memory_space<vmem>>, %arg8: memref<8x128xbf16, #tpu.memory_space<vmem>>, %arg9: memref<8x128xf32, #tpu.memory_space<vmem>>, %arg10: memref<8x!tpu.dma_semaphore, #tpu.memory_space<semaphore_mem>>) attributes {dimension_semantics = [], scalar_prefetch = 0 : i64, scratch_operands = 2 : i64, tpu.core_type = #tpu.core_type<tc>} {
    %c0 = arith.constant 0 : index
    %0 = memref.load %arg0[%c0] : memref<8xi32, #tpu.memory_space<smem>>
    %c0_i32 = arith.constant 0 : i32
    %c0_i32_0 = arith.constant 0 : i32
    %1 = tpu.memref_slice %arg1[%0, %c0_i32_0] : memref<500x128xf32, #tpu.memory_space<any>> -> memref<1x128xf32, #tpu.memory_space<any>>
    %c0_i32_1 = arith.constant 0 : i32
    %c0_i32_2 = arith.constant 0 : i32
    %2 = tpu.memref_slice %arg9[%c0_i32_1, %c0_i32_2] : memref<8x128xf32, #tpu.memory_space<vmem>> -> memref<1x128xf32, #tpu.memory_space<vmem>>
    %3 = tpu.memref_slice %arg10[%c0_i32] : memref<8x!tpu.dma_semaphore, #tpu.memory_space<semaphore_mem>> -> memref<1x!tpu.dma_semaphore, #tpu.memory_space<semaphore_mem>>
    %4 = tpu.memref_squeeze %3 : memref<1x!tpu.dma_semaphore, #tpu.memory_space<semaphore_mem>> -> memref<!tpu.dma_semaphore, #tpu.memory_space<semaphore_mem>>
    tpu.enqueue_dma source(%1 : memref<1x128xf32, #tpu.memory_space<any>>) target(%2 : memref<1x128xf32, #tpu.memory_space<vmem>>) target_semaphore(%4 : memref<!tpu.dma_semaphore, #tpu.memory_space<semaphore_mem>>)
    %c1 = arith.constant 1 : index
    %5 = memref.load %arg0[%c1] : memref<8xi32, #tpu.memory_space<smem>>
    %c1_i32 = arith.constant 1 : i32
    %c0_i32_3 = arith.constant 0 : i32
    %6 = tpu.memref_slice %arg1[%5, %c0_i32_3] : memref<500x128xf32, #tpu.memory_space<any>> -> memref<1x128xf32, #tpu.memory_space<any>>
    %c1_i32_4 = arith.constant 1 : i32
    %c0_i32_5 = arith.constant 0 : i32
    %7 = tpu.memref_slice %arg9[%c1_i32_4, %c0_i32_5] : memref<8x128xf32, #tpu.memory_space<vmem>> -> memref<1x128xf32, #tpu.memory_space<vmem>>
    %8 = tpu.memref_slice %arg10[%c1_i32] : memref<8x!tpu.dma_semaphore, #tpu.memory_space<semaphore_mem>> -> memref<1x!tpu.dma_semaphore, #tpu.memory_space<semaphore_mem>>
    %9 = tpu.memref_squeeze %8 : memref<1x!tpu.dma_semaphore, #tpu.memory_space<semaphore_mem>> -> memref<!tpu.dma_semaphore, #tpu.memory_space<semaphore_mem>>
    tpu.enqueue_dma source(%6 : memref<1x128xf32, #tpu.memory_space<any>>) target(%7 : memref<1x128xf32, #tpu.memory_space<vmem>>) target_semaphore(%9 : memref<!tpu.dma_semaphore, #tpu.memory_space<semaphore_mem>>)
    %c2 = arith.constant 2 : index
    %10 = memref.load %arg0[%c2] : memref<8xi32, #tpu.memory_space<smem>>
    %c2_i32 = arith.constant 2 : i32
    %c0_i32_6 = arith.constant 0 : i32
    %11 = tpu.memref_slice %arg1[%10, %c0_i32_6] : memref<500x128xf32, #tpu.memory_space<any>> -> memref<1x128xf32, #tpu.memory_space<any>>
    %c2_i32_7 = arith.constant 2 : i32
    %c0_i32_8 = arith.constant 0 : i32
    %12 = tpu.memref_slice %arg9[%c2_i32_7, %c0_i32_8] : memref<8x128xf32, #tpu.memory_space<vmem>> -> memref<1x128xf32, #tpu.memory_space<vmem>>
    %13 = tpu.memref_slice %arg10[%c2_i32] : memref<8x!tpu.dma_semaphore, #tpu.memory_space<semaphore_mem>> -> memref<1x!tpu.dma_semaphore, #tpu.memory_space<semaphore_mem>>
    %14 = tpu.memref_squeeze %13 : memref<1x!tpu.dma_semaphore, #tpu.memory_space<semaphore_mem>> -> memref<!tpu.dma_semaphore, #tpu.memory_space<semaphore_mem>>
    tpu.enqueue_dma source(%11 : memref<1x128xf32, #tpu.memory_space<any>>) target(%12 : memref<1x128xf32, #tpu.memory_space<vmem>>) target_semaphore(%14 : memref<!tpu.dma_semaphore, #tpu.memory_space<semaphore_mem>>)
    %c3 = arith.constant 3 : index
    %15 = memref.load %arg0[%c3] : memref<8xi32, #tpu.memory_space<smem>>
    %c3_i32 = arith.constant 3 : i32
    %c0_i32_9 = arith.constant 0 : i32
    %16 = tpu.memref_slice %arg1[%15, %c0_i32_9] : memref<500x128xf32, #tpu.memory_space<any>> -> memref<1x128xf32, #tpu.memory_space<any>>
    %c3_i32_10 = arith.constant 3 : i32
    %c0_i32_11 = arith.constant 0 : i32
    %17 = tpu.memref_slice %arg9[%c3_i32_10, %c0_i32_11] : memref<8x128xf32, #tpu.memory_space<vmem>> -> memref<1x128xf32, #tpu.memory_space<vmem>>
    %18 = tpu.memref_slice %arg10[%c3_i32] : memref<8x!tpu.dma_semaphore, #tpu.memory_space<semaphore_mem>> -> memref<1x!tpu.dma_semaphore, #tpu.memory_space<semaphore_mem>>
    %19 = tpu.memref_squeeze %18 : memref<1x!tpu.dma_semaphore, #tpu.memory_space<semaphore_mem>> -> memref<!tpu.dma_semaphore, #tpu.memory_space<semaphore_mem>>
    tpu.enqueue_dma source(%16 : memref<1x128xf32, #tpu.memory_space<any>>) target(%17 : memref<1x128xf32, #tpu.memory_space<vmem>>) target_semaphore(%19 : memref<!tpu.dma_semaphore, #tpu.memory_space<semaphore_mem>>)
    %c4 = arith.constant 4 : index
    %20 = memref.load %arg0[%c4] : memref<8xi32, #tpu.memory_space<smem>>
    %c4_i32 = arith.constant 4 : i32
    %c0_i32_12 = arith.constant 0 : i32
    %21 = tpu.memref_slice %arg1[%20, %c0_i32_12] : memref<500x128xf32, #tpu.memory_space<any>> -> memref<1x128xf32, #tpu.memory_space<any>>
    %c4_i32_13 = arith.constant 4 : i32
    %c0_i32_14 = arith.constant 0 : i32
    %22 = tpu.memref_slice %arg9[%c4_i32_13, %c0_i32_14] : memref<8x128xf32, #tpu.memory_space<vmem>> -> memref<1x128xf32, #tpu.memory_space<vmem>>
    %23 = tpu.memref_slice %arg10[%c4_i32] : memref<8x!tpu.dma_semaphore, #tpu.memory_space<semaphore_mem>> -> memref<1x!tpu.dma_semaphore, #tpu.memory_space<semaphore_mem>>
    %24 = tpu.memref_squeeze %23 : memref<1x!tpu.dma_semaphore, #tpu.memory_space<semaphore_mem>> -> memref<!tpu.dma_semaphore, #tpu.memory_space<semaphore_mem>>
    tpu.enqueue_dma source(%21 : memref<1x128xf32, #tpu.memory_space<any>>) target(%22 : memref<1x128xf32, #tpu.memory_space<vmem>>) target_semaphore(%24 : memref<!tpu.dma_semaphore, #tpu.memory_space<semaphore_mem>>)
    %c5 = arith.constant 5 : index
    %25 = memref.load %arg0[%c5] : memref<8xi32, #tpu.memory_space<smem>>
    %c5_i32 = arith.constant 5 : i32
    %c0_i32_15 = arith.constant 0 : i32
    %26 = tpu.memref_slice %arg1[%25, %c0_i32_15] : memref<500x128xf32, #tpu.memory_space<any>> -> memref<1x128xf32, #tpu.memory_space<any>>
    %c5_i32_16 = arith.constant 5 : i32
    %c0_i32_17 = arith.constant 0 : i32
    %27 = tpu.memref_slice %arg9[%c5_i32_16, %c0_i32_17] : memref<8x128xf32, #tpu.memory_space<vmem>> -> memref<1x128xf32, #tpu.memory_space<vmem>>
    %28 = tpu.memref_slice %arg10[%c5_i32] : memref<8x!tpu.dma_semaphore, #tpu.memory_space<semaphore_mem>> -> memref<1x!tpu.dma_semaphore, #tpu.memory_space<semaphore_mem>>
    %29 = tpu.memref_squeeze %28 : memref<1x!tpu.dma_semaphore, #tpu.memory_space<semaphore_mem>> -> memref<!tpu.dma_semaphore, #tpu.memory_space<semaphore_mem>>
    tpu.enqueue_dma source(%26 : memref<1x128xf32, #tpu.memory_space<any>>) target(%27 : memref<1x128xf32, #tpu.memory_space<vmem>>) target_semaphore(%29 : memref<!tpu.dma_semaphore, #tpu.memory_space<semaphore_mem>>)
    %c6 = arith.constant 6 : index
    %30 = memref.load %arg0[%c6] : memref<8xi32, #tpu.memory_space<smem>>
    %c6_i32 = arith.constant 6 : i32
    %c0_i32_18 = arith.constant 0 : i32
    %31 = tpu.memref_slice %arg1[%30, %c0_i32_18] : memref<500x128xf32, #tpu.memory_space<any>> -> memref<1x128xf32, #tpu.memory_space<any>>
    %c6_i32_19 = arith.constant 6 : i32
    %c0_i32_20 = arith.constant 0 : i32
    %32 = tpu.memref_slice %arg9[%c6_i32_19, %c0_i32_20] : memref<8x128xf32, #tpu.memory_space<vmem>> -> memref<1x128xf32, #tpu.memory_space<vmem>>
    %33 = tpu.memref_slice %arg10[%c6_i32] : memref<8x!tpu.dma_semaphore, #tpu.memory_space<semaphore_mem>> -> memref<1x!tpu.dma_semaphore, #tpu.memory_space<semaphore_mem>>
    %34 = tpu.memref_squeeze %33 : memref<1x!tpu.dma_semaphore, #tpu.memory_space<semaphore_mem>> -> memref<!tpu.dma_semaphore, #tpu.memory_space<semaphore_mem>>
    tpu.enqueue_dma source(%31 : memref<1x128xf32, #tpu.memory_space<any>>) target(%32 : memref<1x128xf32, #tpu.memory_space<vmem>>) target_semaphore(%34 : memref<!tpu.dma_semaphore, #tpu.memory_space<semaphore_mem>>)
    %c7 = arith.constant 7 : index
    %35 = memref.load %arg0[%c7] : memref<8xi32, #tpu.memory_space<smem>>
    %c7_i32 = arith.constant 7 : i32
    %c0_i32_21 = arith.constant 0 : i32
    %36 = tpu.memref_slice %arg1[%35, %c0_i32_21] : memref<500x128xf32, #tpu.memory_space<any>> -> memref<1x128xf32, #tpu.memory_space<any>>
    %c7_i32_22 = arith.constant 7 : i32
    %c0_i32_23 = arith.constant 0 : i32
    %37 = tpu.memref_slice %arg9[%c7_i32_22, %c0_i32_23] : memref<8x128xf32, #tpu.memory_space<vmem>> -> memref<1x128xf32, #tpu.memory_space<vmem>>
    %38 = tpu.memref_slice %arg10[%c7_i32] : memref<8x!tpu.dma_semaphore, #tpu.memory_space<semaphore_mem>> -> memref<1x!tpu.dma_semaphore, #tpu.memory_space<semaphore_mem>>
    %39 = tpu.memref_squeeze %38 : memref<1x!tpu.dma_semaphore, #tpu.memory_space<semaphore_mem>> -> memref<!tpu.dma_semaphore, #tpu.memory_space<semaphore_mem>>
    tpu.enqueue_dma source(%36 : memref<1x128xf32, #tpu.memory_space<any>>) target(%37 : memref<1x128xf32, #tpu.memory_space<vmem>>) target_semaphore(%39 : memref<!tpu.dma_semaphore, #tpu.memory_space<semaphore_mem>>)
    %c0_24 = arith.constant 0 : index
    %c0_25 = arith.constant 0 : index
    %40 = vector.load %arg6[%c0_24, %c0_25] : memref<8x128xf32, #tpu.memory_space<vmem>>, vector<8x128xf32>
    %41 = arith.truncf %40 : vector<8x128xf32> to vector<8x128xbf16>
    %c0_26 = arith.constant 0 : index
    %c0_27 = arith.constant 0 : index
    %42 = vector.load %arg3[%c0_26, %c0_27] : memref<128x384xbf16, #tpu.memory_space<vmem>>, vector<128x384xbf16>
    %cst = arith.constant dense<0.000000e+00> : vector<8x384xf32>
    %43 = tpu.matmul %41, %42, %cst {dimension_numbers = #tpu.dot_dimension_numbers<[1], [0], [0], [1], [0, 0, 1, 1], [], []>} : vector<8x128xbf16>, vector<128x384xbf16>, vector<8x384xf32> -> vector<8x384xf32>
    %c0_28 = arith.constant 0 : index
    %c0_29 = arith.constant 0 : index
    %44 = vector.load %arg5[%c0_28, %c0_29] : memref<1x384xf32, #tpu.memory_space<vmem>>, vector<1x384xf32>
    %45 = vector.broadcast %44 : vector<1x384xf32> to vector<8x384xf32>
    %46 = arith.addf %43, %45 : vector<8x384xf32>
    %c0_i32_30 = arith.constant 0 : i32
    %c0_i32_31 = arith.constant 0 : i32
    %47 = tpu.memref_slice %arg1[%0, %c0_i32_31] : memref<500x128xf32, #tpu.memory_space<any>> -> memref<1x128xf32, #tpu.memory_space<any>>
    %c0_i32_32 = arith.constant 0 : i32
    %c0_i32_33 = arith.constant 0 : i32
    %48 = tpu.memref_slice %arg9[%c0_i32_32, %c0_i32_33] : memref<8x128xf32, #tpu.memory_space<vmem>> -> memref<1x128xf32, #tpu.memory_space<vmem>>
    %49 = tpu.memref_slice %arg10[%c0_i32_30] : memref<8x!tpu.dma_semaphore, #tpu.memory_space<semaphore_mem>> -> memref<1x!tpu.dma_semaphore, #tpu.memory_space<semaphore_mem>>
    %50 = tpu.memref_squeeze %49 : memref<1x!tpu.dma_semaphore, #tpu.memory_space<semaphore_mem>> -> memref<!tpu.dma_semaphore, #tpu.memory_space<semaphore_mem>>
    tpu.wait_dma2 semaphore(%50 : memref<!tpu.dma_semaphore, #tpu.memory_space<semaphore_mem>>) src(%47 : memref<1x128xf32, #tpu.memory_space<any>>) dst(%48 : memref<1x128xf32, #tpu.memory_space<vmem>>)
    %c1_i32_34 = arith.constant 1 : i32
    %c0_i32_35 = arith.constant 0 : i32
    %51 = tpu.memref_slice %arg1[%5, %c0_i32_35] : memref<500x128xf32, #tpu.memory_space<any>> -> memref<1x128xf32, #tpu.memory_space<any>>
    %c1_i32_36 = arith.constant 1 : i32
    %c0_i32_37 = arith.constant 0 : i32
    %52 = tpu.memref_slice %arg9[%c1_i32_36, %c0_i32_37] : memref<8x128xf32, #tpu.memory_space<vmem>> -> memref<1x128xf32, #tpu.memory_space<vmem>>
    %53 = tpu.memref_slice %arg10[%c1_i32_34] : memref<8x!tpu.dma_semaphore, #tpu.memory_space<semaphore_mem>> -> memref<1x!tpu.dma_semaphore, #tpu.memory_space<semaphore_mem>>
    %54 = tpu.memref_squeeze %53 : memref<1x!tpu.dma_semaphore, #tpu.memory_space<semaphore_mem>> -> memref<!tpu.dma_semaphore, #tpu.memory_space<semaphore_mem>>
    tpu.wait_dma2 semaphore(%54 : memref<!tpu.dma_semaphore, #tpu.memory_space<semaphore_mem>>) src(%51 : memref<1x128xf32, #tpu.memory_space<any>>) dst(%52 : memref<1x128xf32, #tpu.memory_space<vmem>>)
    %c2_i32_38 = arith.constant 2 : i32
    %c0_i32_39 = arith.constant 0 : i32
    %55 = tpu.memref_slice %arg1[%10, %c0_i32_39] : memref<500x128xf32, #tpu.memory_space<any>> -> memref<1x128xf32, #tpu.memory_space<any>>
    %c2_i32_40 = arith.constant 2 : i32
    %c0_i32_41 = arith.constant 0 : i32
    %56 = tpu.memref_slice %arg9[%c2_i32_40, %c0_i32_41] : memref<8x128xf32, #tpu.memory_space<vmem>> -> memref<1x128xf32, #tpu.memory_space<vmem>>
    %57 = tpu.memref_slice %arg10[%c2_i32_38] : memref<8x!tpu.dma_semaphore, #tpu.memory_space<semaphore_mem>> -> memref<1x!tpu.dma_semaphore, #tpu.memory_space<semaphore_mem>>
    %58 = tpu.memref_squeeze %57 : memref<1x!tpu.dma_semaphore, #tpu.memory_space<semaphore_mem>> -> memref<!tpu.dma_semaphore, #tpu.memory_space<semaphore_mem>>
    tpu.wait_dma2 semaphore(%58 : memref<!tpu.dma_semaphore, #tpu.memory_space<semaphore_mem>>) src(%55 : memref<1x128xf32, #tpu.memory_space<any>>) dst(%56 : memref<1x128xf32, #tpu.memory_space<vmem>>)
    %c3_i32_42 = arith.constant 3 : i32
    %c0_i32_43 = arith.constant 0 : i32
    %59 = tpu.memref_slice %arg1[%15, %c0_i32_43] : memref<500x128xf32, #tpu.memory_space<any>> -> memref<1x128xf32, #tpu.memory_space<any>>
    %c3_i32_44 = arith.constant 3 : i32
    %c0_i32_45 = arith.constant 0 : i32
    %60 = tpu.memref_slice %arg9[%c3_i32_44, %c0_i32_45] : memref<8x128xf32, #tpu.memory_space<vmem>> -> memref<1x128xf32, #tpu.memory_space<vmem>>
    %61 = tpu.memref_slice %arg10[%c3_i32_42] : memref<8x!tpu.dma_semaphore, #tpu.memory_space<semaphore_mem>> -> memref<1x!tpu.dma_semaphore, #tpu.memory_space<semaphore_mem>>
    %62 = tpu.memref_squeeze %61 : memref<1x!tpu.dma_semaphore, #tpu.memory_space<semaphore_mem>> -> memref<!tpu.dma_semaphore, #tpu.memory_space<semaphore_mem>>
    tpu.wait_dma2 semaphore(%62 : memref<!tpu.dma_semaphore, #tpu.memory_space<semaphore_mem>>) src(%59 : memref<1x128xf32, #tpu.memory_space<any>>) dst(%60 : memref<1x128xf32, #tpu.memory_space<vmem>>)
    %c4_i32_46 = arith.constant 4 : i32
    %c0_i32_47 = arith.constant 0 : i32
    %63 = tpu.memref_slice %arg1[%20, %c0_i32_47] : memref<500x128xf32, #tpu.memory_space<any>> -> memref<1x128xf32, #tpu.memory_space<any>>
    %c4_i32_48 = arith.constant 4 : i32
    %c0_i32_49 = arith.constant 0 : i32
    %64 = tpu.memref_slice %arg9[%c4_i32_48, %c0_i32_49] : memref<8x128xf32, #tpu.memory_space<vmem>> -> memref<1x128xf32, #tpu.memory_space<vmem>>
    %65 = tpu.memref_slice %arg10[%c4_i32_46] : memref<8x!tpu.dma_semaphore, #tpu.memory_space<semaphore_mem>> -> memref<1x!tpu.dma_semaphore, #tpu.memory_space<semaphore_mem>>
    %66 = tpu.memref_squeeze %65 : memref<1x!tpu.dma_semaphore, #tpu.memory_space<semaphore_mem>> -> memref<!tpu.dma_semaphore, #tpu.memory_space<semaphore_mem>>
    tpu.wait_dma2 semaphore(%66 : memref<!tpu.dma_semaphore, #tpu.memory_space<semaphore_mem>>) src(%63 : memref<1x128xf32, #tpu.memory_space<any>>) dst(%64 : memref<1x128xf32, #tpu.memory_space<vmem>>)
    %c5_i32_50 = arith.constant 5 : i32
    %c0_i32_51 = arith.constant 0 : i32
    %67 = tpu.memref_slice %arg1[%25, %c0_i32_51] : memref<500x128xf32, #tpu.memory_space<any>> -> memref<1x128xf32, #tpu.memory_space<any>>
    %c5_i32_52 = arith.constant 5 : i32
    %c0_i32_53 = arith.constant 0 : i32
    %68 = tpu.memref_slice %arg9[%c5_i32_52, %c0_i32_53] : memref<8x128xf32, #tpu.memory_space<vmem>> -> memref<1x128xf32, #tpu.memory_space<vmem>>
    %69 = tpu.memref_slice %arg10[%c5_i32_50] : memref<8x!tpu.dma_semaphore, #tpu.memory_space<semaphore_mem>> -> memref<1x!tpu.dma_semaphore, #tpu.memory_space<semaphore_mem>>
    %70 = tpu.memref_squeeze %69 : memref<1x!tpu.dma_semaphore, #tpu.memory_space<semaphore_mem>> -> memref<!tpu.dma_semaphore, #tpu.memory_space<semaphore_mem>>
    tpu.wait_dma2 semaphore(%70 : memref<!tpu.dma_semaphore, #tpu.memory_space<semaphore_mem>>) src(%67 : memref<1x128xf32, #tpu.memory_space<any>>) dst(%68 : memref<1x128xf32, #tpu.memory_space<vmem>>)
    %c6_i32_54 = arith.constant 6 : i32
    %c0_i32_55 = arith.constant 0 : i32
    %71 = tpu.memref_slice %arg1[%30, %c0_i32_55] : memref<500x128xf32, #tpu.memory_space<any>> -> memref<1x128xf32, #tpu.memory_space<any>>
    %c6_i32_56 = arith.constant 6 : i32
    %c0_i32_57 = arith.constant 0 : i32
    %72 = tpu.memref_slice %arg9[%c6_i32_56, %c0_i32_57] : memref<8x128xf32, #tpu.memory_space<vmem>> -> memref<1x128xf32, #tpu.memory_space<vmem>>
    %73 = tpu.memref_slice %arg10[%c6_i32_54] : memref<8x!tpu.dma_semaphore, #tpu.memory_space<semaphore_mem>> -> memref<1x!tpu.dma_semaphore, #tpu.memory_space<semaphore_mem>>
    %74 = tpu.memref_squeeze %73 : memref<1x!tpu.dma_semaphore, #tpu.memory_space<semaphore_mem>> -> memref<!tpu.dma_semaphore, #tpu.memory_space<semaphore_mem>>
    tpu.wait_dma2 semaphore(%74 : memref<!tpu.dma_semaphore, #tpu.memory_space<semaphore_mem>>) src(%71 : memref<1x128xf32, #tpu.memory_space<any>>) dst(%72 : memref<1x128xf32, #tpu.memory_space<vmem>>)
    %c7_i32_58 = arith.constant 7 : i32
    %c0_i32_59 = arith.constant 0 : i32
    %75 = tpu.memref_slice %arg1[%35, %c0_i32_59] : memref<500x128xf32, #tpu.memory_space<any>> -> memref<1x128xf32, #tpu.memory_space<any>>
    %c7_i32_60 = arith.constant 7 : i32
    %c0_i32_61 = arith.constant 0 : i32
    %76 = tpu.memref_slice %arg9[%c7_i32_60, %c0_i32_61] : memref<8x128xf32, #tpu.memory_space<vmem>> -> memref<1x128xf32, #tpu.memory_space<vmem>>
    %77 = tpu.memref_slice %arg10[%c7_i32_58] : memref<8x!tpu.dma_semaphore, #tpu.memory_space<semaphore_mem>> -> memref<1x!tpu.dma_semaphore, #tpu.memory_space<semaphore_mem>>
    %78 = tpu.memref_squeeze %77 : memref<1x!tpu.dma_semaphore, #tpu.memory_space<semaphore_mem>> -> memref<!tpu.dma_semaphore, #tpu.memory_space<semaphore_mem>>
    tpu.wait_dma2 semaphore(%78 : memref<!tpu.dma_semaphore, #tpu.memory_space<semaphore_mem>>) src(%75 : memref<1x128xf32, #tpu.memory_space<any>>) dst(%76 : memref<1x128xf32, #tpu.memory_space<vmem>>)
    %c0_62 = arith.constant 0 : index
    %c0_63 = arith.constant 0 : index
    %79 = vector.load %arg9[%c0_62, %c0_63] : memref<8x128xf32, #tpu.memory_space<vmem>>, vector<8x128xf32>
    %80 = arith.truncf %79 : vector<8x128xf32> to vector<8x128xbf16>
    %c0_64 = arith.constant 0 : index
    %c0_65 = arith.constant 0 : index
    %81 = vector.load %arg2[%c0_64, %c0_65] : memref<128x384xbf16, #tpu.memory_space<vmem>>, vector<128x384xbf16>
    %cst_66 = arith.constant dense<0.000000e+00> : vector<8x384xf32>
    %82 = tpu.matmul %80, %81, %cst_66 {dimension_numbers = #tpu.dot_dimension_numbers<[1], [0], [0], [1], [0, 0, 1, 1], [], []>} : vector<8x128xbf16>, vector<128x384xbf16>, vector<8x384xf32> -> vector<8x384xf32>
    %c0_67 = arith.constant 0 : index
    %c0_68 = arith.constant 0 : index
    %83 = vector.load %arg4[%c0_67, %c0_68] : memref<1x384xf32, #tpu.memory_space<vmem>>, vector<1x384xf32>
    %84 = vector.broadcast %83 : vector<1x384xf32> to vector<8x384xf32>
    %85 = arith.addf %82, %84 : vector<8x384xf32>
    %86 = vector.extract_strided_slice %85 {offsets = [0, 0], sizes = [8, 128], strides = [1, 1]} : vector<8x384xf32> to vector<8x128xf32>
    %87 = vector.extract_strided_slice %85 {offsets = [0, 128], sizes = [8, 128], strides = [1, 1]} : vector<8x384xf32> to vector<8x128xf32>
    %88 = vector.extract_strided_slice %85 {offsets = [0, 256], sizes = [8, 128], strides = [1, 1]} : vector<8x384xf32> to vector<8x128xf32>
    %89 = vector.extract_strided_slice %46 {offsets = [0, 0], sizes = [8, 128], strides = [1, 1]} : vector<8x384xf32> to vector<8x128xf32>
    %90 = vector.extract_strided_slice %46 {offsets = [0, 128], sizes = [8, 128], strides = [1, 1]} : vector<8x384xf32> to vector<8x128xf32>
    %91 = vector.extract_strided_slice %46 {offsets = [0, 256], sizes = [8, 128], strides = [1, 1]} : vector<8x384xf32> to vector<8x128xf32>
    %92 = arith.addf %86, %89 : vector<8x128xf32>
    %93 = arith.negf %92 : vector<8x128xf32>
    %94 = math.exp %93 : vector<8x128xf32>
    %cst_69 = arith.constant 1.000000e+00 : f32
    %95 = vector.broadcast %cst_69 : f32 to vector<8x128xf32>
    %96 = arith.addf %95, %94 : vector<8x128xf32>
    %97 = arith.divf %95, %96 : vector<8x128xf32>
    %98 = arith.addf %87, %90 : vector<8x128xf32>
    %99 = arith.negf %98 : vector<8x128xf32>
    %100 = math.exp %99 : vector<8x128xf32>
    %cst_70 = arith.constant 1.000000e+00 : f32
    %101 = vector.broadcast %cst_70 : f32 to vector<8x128xf32>
    %102 = arith.addf %101, %100 : vector<8x128xf32>
    %103 = arith.divf %101, %102 : vector<8x128xf32>
    %104 = arith.mulf %97, %91 : vector<8x128xf32>
    %105 = arith.addf %88, %104 : vector<8x128xf32>
    %106 = math.tanh %105 : vector<8x128xf32>
    %cst_71 = arith.constant 1.000000e+00 : f32
    %107 = vector.broadcast %cst_71 : f32 to vector<8x128xf32>
    %108 = arith.subf %107, %103 : vector<8x128xf32>
    %109 = arith.mulf %108, %106 : vector<8x128xf32>
    %110 = arith.mulf %103, %40 : vector<8x128xf32>
    %111 = arith.addf %109, %110 : vector<8x128xf32>
    %c0_72 = arith.constant 0 : index
    %c0_73 = arith.constant 0 : index
    %112 = vector.load %arg7[%c0_72, %c0_73] : memref<8x128xf32, #tpu.memory_space<vmem>>, vector<8x128xf32>
    tpu.vector_store %arg7[%c0_72, %c0_73], %111 {strides = array<i32>} : memref<8x128xf32, #tpu.memory_space<vmem>>, vector<8x128xf32>,
    %113 = arith.truncf %111 : vector<8x128xf32> to vector<8x128xbf16>
    %c0_74 = arith.constant 0 : index
    %c0_75 = arith.constant 0 : index
    %114 = vector.load %arg8[%c0_74, %c0_75] : memref<8x128xbf16, #tpu.memory_space<vmem>>, vector<8x128xbf16>
    tpu.vector_store %arg8[%c0_74, %c0_75], %113 {strides = array<i32>} : memref<8x128xbf16, #tpu.memory_space<vmem>>, vector<8x128xbf16>,
    return
  }
}

module attributes {stable_mosaic.version = 11 : i64} {
  func.func @_logits_kernel(%arg0: i32, %arg1: memref<8x128xbf16, #tpu.memory_space<vmem>>, %arg2: memref<128x256xi8, #tpu.memory_space<vmem>>, %arg3: memref<1x256xf32, #tpu.memory_space<vmem>>, %arg4: memref<1x256xf32, #tpu.memory_space<vmem>>, %arg5: memref<8x256xf32, #tpu.memory_space<vmem>>) attributes {dimension_semantics = [#tpu.dimension_semantics<parallel>], iteration_bounds = array<i64: 2>, scalar_prefetch = 0 : i64, scratch_operands = 0 : i64, tpu.core_type = #tpu.core_type<tc>, window_params = [{pipeline_mode = #tpu.pipeline_mode<synchronous>, transform_indices = @transform_0, window_bounds = array<i64: 8, 128>}, {transform_indices = @transform_1, window_bounds = array<i64: 128, 256>}, {transform_indices = @transform_2, window_bounds = array<i64: 1, 256>}, {transform_indices = @transform_3, window_bounds = array<i64: 1, 256>}, {transform_indices = @transform_4, window_bounds = array<i64: 8, 256>}]} {
    %c0 = arith.constant 0 : index
    %c0_0 = arith.constant 0 : index
    %0 = vector.load %arg2[%c0, %c0_0] : memref<128x256xi8, #tpu.memory_space<vmem>>, vector<128x256xi8>
    %1 = arith.sitofp %0 : vector<128x256xi8> to vector<128x256xbf16>
    %c0_1 = arith.constant 0 : index
    %c0_2 = arith.constant 0 : index
    %2 = vector.load %arg1[%c0_1, %c0_2] : memref<8x128xbf16, #tpu.memory_space<vmem>>, vector<8x128xbf16>
    %cst = arith.constant dense<0.000000e+00> : vector<8x256xf32>
    %3 = tpu.matmul %2, %1, %cst {dimension_numbers = #tpu.dot_dimension_numbers<[1], [0], [0], [1], [0, 0, 1, 1], [], []>} : vector<8x128xbf16>, vector<128x256xbf16>, vector<8x256xf32> -> vector<8x256xf32>
    %c0_3 = arith.constant 0 : index
    %c0_4 = arith.constant 0 : index
    %4 = vector.load %arg3[%c0_3, %c0_4] : memref<1x256xf32, #tpu.memory_space<vmem>>, vector<1x256xf32>
    %5 = vector.broadcast %4 : vector<1x256xf32> to vector<8x256xf32>
    %6 = arith.mulf %3, %5 : vector<8x256xf32>
    %c0_5 = arith.constant 0 : index
    %c0_6 = arith.constant 0 : index
    %7 = vector.load %arg4[%c0_5, %c0_6] : memref<1x256xf32, #tpu.memory_space<vmem>>, vector<1x256xf32>
    %8 = vector.broadcast %7 : vector<1x256xf32> to vector<8x256xf32>
    %9 = arith.addf %6, %8 : vector<8x256xf32>
    %c0_7 = arith.constant 0 : index
    %c0_8 = arith.constant 0 : index
    %10 = vector.load %arg5[%c0_7, %c0_8] : memref<8x256xf32, #tpu.memory_space<vmem>>, vector<8x256xf32>
    tpu.vector_store %arg5[%c0_7, %c0_8], %9 {strides = array<i32>} : memref<8x256xf32, #tpu.memory_space<vmem>>, vector<8x256xf32>,
    return
  }
  func.func @transform_0(%arg0: i32) -> (i32, i32) {
    %c0_i32 = arith.constant 0 : i32
    %c0_i32_0 = arith.constant 0 : i32
    %c0_i32_1 = arith.constant 0 : i32
    return %c0_i32, %c0_i32_0 : i32, i32
  }
  func.func @transform_1(%arg0: i32) -> (i32, i32) {
    %c0_i32 = arith.constant 0 : i32
    %c0_i32_0 = arith.constant 0 : i32
    return %c0_i32, %arg0 : i32, i32
  }
  func.func @transform_2(%arg0: i32) -> (i32, i32) {
    %c0_i32 = arith.constant 0 : i32
    %c0_i32_0 = arith.constant 0 : i32
    return %c0_i32, %arg0 : i32, i32
  }
  func.func @transform_3(%arg0: i32) -> (i32, i32) {
    %c0_i32 = arith.constant 0 : i32
    %c0_i32_0 = arith.constant 0 : i32
    return %c0_i32, %arg0 : i32, i32
  }
  func.func @transform_4(%arg0: i32) -> (i32, i32) {
    %c0_i32 = arith.constant 0 : i32
    %c0_i32_0 = arith.constant 0 : i32
    return %c0_i32, %arg0 : i32, i32
  }
}

</mosaic_0001>

<bundles_post_ra>
// kernel: decoder_forward.3
= control target key start
LH: loop header
LB: loop body
LE: loop exit
PB: predicated region body
PF: predicated region fallthrough
CT: control target
= control target key end

     0   :  { %s540_s15 = smov 0   ;;  %s542_s16 = smov 0   ;;  %s611_s0 = inlined_call_operand.vmem [shape: bf16[8,128], index: 0, kind: input, shape index: {}]   ;;  %s612_s1 = inlined_call_operand.vmem [shape: s8[128,512], index: 1, kind: input, shape index: {}]   ;;  %s613_s2 = inlined_call_operand.vmem [shape: f32[1,512], index: 2, kind: input, shape index: {}]   ;;  %s614_s3 = inlined_call_operand.vmem [shape: f32[1,512], index: 3, kind: input, shape index: {}]   ;;  %s615_s4 = inlined_call_operand.vmem [shape: f32[8,512], index: 4, kind: output, shape index: {}]  }
   0x1   :  { %s544_s17 = smov 0  }
   0x2 LB: > { %s449_s18 = sadd.s32 4294967295, %s512_s17   ;;  %s557_s19 = sadd.s32 1, %s512_s17   ;;  %s512_s17 = sphi %s544_s17, %s618_s17   ;;  %s508_s16 = sphi %s542_s16, %s617_s16   ;;  %s504_s15 = sphi %s540_s15, %s616_s15  }
   0x3   : > { %s39_s20 = ssub.s32 %s512_s17, %s557_s19  ;;  %s42_s21 = sadd.s32 1, %s508_s16 }
   0x4   : > { %p40_p0 = scmp.eq.s32.totalorder %s39_s20, 0  ;;  %p49_p1 = scmp.ne.s32.totalorder %s508_s16, %s504_s15 }
   0x5   : > { %p50_p2 = scmp.eq.s32.totalorder %s512_s17, 0  ;;  %p452_p4 = scmp.ge.s32.totalorder %s512_s17, 2 }
   0x6   : > { %s566_s22 = scalar_select %p40_p0, %s508_s16, %s42_s21  }
   0x7   : > { %p51_p3 = por %p50_p2, %p49_p1  ;;  %156 = sbr.rel (%p452_p4) target bundleno = 20 (0x14), region = 20 }
   0xc   : > { %159 = sbr.rel (!%p51_p3) target bundleno = 20 (0x14), region = 24  ;;  %s161_s23 = sand.u32 (%p51_p3), 1, %s508_s16  }
   0xd   : > { %s464_s24 = sshll.u32 (%p51_p3), %s512_s17, 4  ;;  %s453_s25 = sshll.u32 (%p51_p3), %s161_s23, 6 }
   0xe   : > { %s166_s28 = scalar_lea.vmem (%p51_p3), %s612_s1, %s464_s24  ;;  %s163_s29 = scalar_lea.vmem (%p51_p3), [#allocation2], %s453_s25 }
   0xf   : > { %v179_v0 = vld [vmem:[%s166_s28] sm:$0xff] (%p51_p3)  ;;  %v181_v1 = vld [vmem:[%s166_s28 + $0x8] sm:$0xff] (%p51_p3) }
  0x10   : > { %v183_v2 = vld [vmem:[%s166_s28 + $0x20] sm:$0xff] (%p51_p3)  ;;  %180 = vst [vmem:[%s163_s29] sm:$0xff] (%p51_p3), %v179_v0  ;;  %182 = vst [vmem:[%s163_s29 + $0x8] sm:$0xff] (%p51_p3), %v181_v1  ;;  %v185_v3 = vld [vmem:[%s166_s28 + $0x28] sm:$0xff] (%p51_p3) }
  0x11   : > { %184 = vst [vmem:[%s163_s29 + $0x10] sm:$0xff] %v183_v2  ;;  %v187_v4 = vld [vmem:[%s166_s28 + $0x40] sm:$0xff]  ;;  %v189_v5 = vld [vmem:[%s166_s28 + $0x48] sm:$0xff]  ;;  %186 = vst [vmem:[%s163_s29 + $0x18] sm:$0xff] %v185_v3 }
  0x12   : > { %188 = vst [vmem:[%s163_s29 + $0x20] sm:$0xff] %v187_v4  ;;  %190 = vst [vmem:[%s163_s29 + $0x28] sm:$0xff] %v189_v5  ;;  %v191_v6 = vld [vmem:[%s166_s28 + $0x60] sm:$0xff]  ;;  %v193_v7 = vld [vmem:[%s166_s28 + $0x68] sm:$0xff] }
  0x13   : > { %192 = vst [vmem:[%s163_s29 + $0x30] sm:$0xff] %v191_v6  ;;  %194 = vst [vmem:[%s163_s29 + $0x38] sm:$0xff] %v193_v7 }
  0x14 PF: > { %p456_p5 = scmp.ge.s32.totalorder %s512_s17, 1  ;;  %p215_p6 = scmp.lt.s32.totalorder %s512_s17, 3 }
  0x16   : > { %p216_p7 = pnand %p456_p5, %p215_p6 }
  0x17   : > { %s222_s30 = sand.u32 (!%p216_p7), 1, %s504_s15   ;;  %s458_s9 = sshll.u32 (!%p216_p7), %s449_s18, 1 }
  0x18   : > { %219 = sbr.rel (%p216_p7) target bundleno = 264 (0x108), region = 55  ;;  %s457_s5 = sshll.u32 (!%p216_p7), %s222_s30, 6 }
  0x19   : > { %s577_s6 = scalar_lea.vmem (!%p216_p7), [#allocation2], %s457_s5  ;;  %p257_p8 = scmp.lt.s32.totalorder (!%p216_p7), %s458_s9, 3 }
  0x1d   : > { %v514_v8 = vmov 0   ;;  %v280_v9 = vld [vmem:[%s577_s6 + $0x38] sm:$0xff]  ;;  %v279_v10 = vld [vmem:[%s577_s6 + $0x30] sm:$0xff]  ;;  %v278_v14 = vld [vmem:[%s577_s6 + $0x28] sm:$0xff]  ;;  %v341_v34 = vlaneseq  ;;  %s620_s9 = smov (!%p257_p8, %s458_s9), 3 }
  0x1e   : > { %330 = vmatprep.mubr.bf16.mxu0 %v514_v8  ;;  %v294_v11 = vunpack.c.l.s8.bf16 %v280_v9  ;;  %v296_v12 = vunpack.c.h.s8.bf16 %v280_v9  ;;  %v295_v13 = vunpack.c.h.s8.bf16 %v279_v10  ;;  %v293_v15 = vunpack.c.l.s8.bf16 %v279_v10  ;;  %v277_v17 = vld [vmem:[%s577_s6 + $0x20] sm:$0xff]  ;;  %v276_v20 = vld [vmem:[%s577_s6 + $0x18] sm:$0xff]  ;;  %v275_v23 = vld [vmem:[%s577_s6 + $0x10] sm:$0xff]  ;;  %s259_s12 = scalar_lea.vmem %s613_s2, %s620_s9  ;;  %s264_s15 = scalar_lea.vmem %s614_s3, %s620_s9 }
  0x1f   : > { %v292_v16 = vunpack.c.h.s8.bf16 %v278_v14  ;;  %v291_v18 = vunpack.c.h.s8.bf16 %v277_v17  ;;  %v290_v19 = vunpack.c.l.s8.bf16 %v278_v14  ;;  %v289_v21 = vunpack.c.l.s8.bf16 %v277_v17  ;;  %v274_v26 = vld [vmem:[%s577_s6 + $0x8] sm:$0xff]  ;;  %v273_v29 = vld [vmem:[%s577_s6] sm:$0xff]  ;;  %s461_s20 = sshll.u32 %s620_s9, 3 }
  0x20   : > { %298 = vmatprep.subr.bf16.mxu0 %v296_v12  ;;  %v288_v22 = vunpack.c.h.s8.bf16 %v276_v20  ;;  %v287_v24 = vunpack.c.h.s8.bf16 %v275_v23  ;;  %v286_v25 = vunpack.c.l.s8.bf16 %v276_v20  ;;  %v285_v27 = vunpack.c.l.s8.bf16 %v275_v23  ;;  %v297_v33 = vld [vmem:[%s611_s0] sm:$0xf]  ;;  %s270_s21 = scalar_lea.vmem %s615_s4, %s461_s20 }
  0x21   : > { %299 = vmatpush1.bf16.msra.mxu0 %v295_v13  ;;  %v284_v28 = vunpack.c.h.s8.bf16 %v274_v26  ;;  %v283_v30 = vunpack.c.h.s8.bf16 %v273_v29  ;;  %v282_v31 = vunpack.c.l.s8.bf16 %v274_v26  ;;  %v281_v32 = vunpack.c.l.s8.bf16 %v273_v29  ;;  %v339_v37 = vld [vmem:[%s259_s12] sm:$0x3] }
  0x22   : > { %300 = vmatprep.subr.bf16.mxu0 %v294_v11  ;;  %v342_v35 = vshrl.u32 %v341_v34, 7  ;;  %v353_v39 = vld [vmem:[%s264_s15] sm:$0x3] }
  0x24   : > { %v343_v36 = vsub.s32 0, %v342_v35  ;;  %v347_v38 = vsub.s32 1, %v342_v35 }
  0x25   : > { %301 = vmatpush1.bf16.msra.mxu0 %v293_v15 }
  0x26   : > { %302 = vmatprep.subr.bf16.mxu0 %v292_v16  ;;  %v344_v40 = vrot.slane %v339_v37, %v343_v36  ;;  %v358_v41 = vrot.slane %v353_v39, %v343_v36  ;;  %v348_v42 = vrot.slane %v339_v37, %v347_v38  ;;  %v362_v45 = vrot.slane %v353_v39, %v347_v38 }
  0x29   : > { %303 = vmatpush1.bf16.msra.mxu0 %v291_v18 }
  0x2a   : > { %304 = vmatprep.subr.bf16.mxu0 %v290_v19 }
  0x2d   : > { %305 = vmatpush1.bf16.msra.mxu0 %v289_v21 }
  0x2e   : > { %306 = vmatprep.subr.bf16.mxu0 %v288_v22 }
  0x31   : > { %307 = vmatpush1.bf16.msra.mxu0 %v287_v24 }
  0x32   : > { %308 = vmatprep.subr.bf16.mxu0 %v286_v25 }
  0x35   : > { %309 = vmatpush1.bf16.msra.mxu0 %v285_v27 }
  0x36   : > { %310 = vmatprep.subr.bf16.mxu0 %v284_v28 }
  0x39   : > { %311 = vmatpush1.bf16.msra.mxu0 %v283_v30 }
  0x3a   : > { %312 = vmatprep.subr.bf16.mxu0 %v282_v31 }
  0x3d   : > { %313 = vmatpush1.bf16.msra.mxu0 %v281_v32 }
  0x40   : > { %331 = vmatmul.mubr.bf16.vlgmr.msra.gmra.mxu0 %v297_v33 }
 0x100   : > { %v332_v43 = vpop.f32.mrf.mxu0 }
 0x101   : > { %v351_v44 = vmul.f32 %v344_v40, %v332_v43 }
 0x102   : > { %v334_v46 = vpop.f32.mrf.mxu0 }
 0x103   : > { %v365_v47 = vadd.f32 %v358_v41, %v351_v44  ;;  %v352_v48 = vmul.f32 %v348_v42, %v334_v46 }
 0x104   : > { %v336_v49 = vpop.f32.mrf.mxu0 }
 0x105   : > { %367 = vst [vmem:[%s270_s21] sm:$0xff] %v365_v47  ;;  %v366_v50 = vadd.f32 %v362_v45, %v352_v48 }
 0x106   : > { %v337_v51 = vpop.f32.mrf.mxu0 }
 0x107   : > { %368 = vst [vmem:[%s270_s21 + $0x8] sm:$0xff] %v366_v50 }
 0x108 PF: > { %p11_p9 = scmp.ge.s32.totalorder %s557_s19, 4   ;;  %s616_s15 = smov %s508_s16 }
 0x109   : > { %s617_s16 = smov %s566_s22  ;;  %s618_s17 = smov %s557_s19 }
 0x10a   :  { %13 = sbr.rel (!%p11_p9) target bundleno = 2 (0x2), region = 100 }

// kernel: decoder_forward.2
= control target key start
LH: loop header
LB: loop body
LE: loop exit
PB: predicated region body
PF: predicated region fallthrough
CT: control target
= control target key end

     0   :  { %14 = vsyncpa [#allocation6], 0  ;;  %s1562_s0 = inlined_call_operand.vmem [shape: s32[8], index: 0, kind: input, shape index: {}]   ;;  %s1563_s1 = inlined_call_operand.hbm [shape: f32[500,128], index: 1, kind: input, shape index: {}]   ;;  %s1564_s2 = inlined_call_operand.hbm [shape: bf16[128,384], index: 2, kind: input, shape index: {}]   ;;  %s1565_s3 = inlined_call_operand.hbm [shape: bf16[128,384], index: 3, kind: input, shape index: {}]   ;;  %s1566_s4 = inlined_call_operand.vmem [shape: f32[1,384], index: 4, kind: input, shape index: {}]   ;;  %s1567_s5 = inlined_call_operand.vmem [shape: f32[1,384], index: 5, kind: input, shape index: {}]   ;;  %s1568_s6 = inlined_call_operand.vmem [shape: f32[8,128], index: 6, kind: input, shape index: {}]   ;;  %s1569_s7 = inlined_call_operand.vmem [shape: f32[8,128], index: 7, kind: output, shape index: {0}]   ;;  %s1570_s8 = inlined_call_operand.vmem [shape: bf16[8,128], index: 8, kind: output, shape index: {1}]  }
   0x1   :  { %15 = vsyncpa [#allocation5], 0  ;;  %s23_s29 = sshll.u32 %s1562_s0, 4  ;;  %s24_s29 = int_to_ptr.vmem [resolvable:$true] %s23_s29 }
   0x2   :  { %16 = vsyncpa [#allocation9], 0  ;;  %s1058_s30 = scalar_lea.vmem %s24_s29, 16  ;;  %p1063_p1 = scmp.lt.s32.totalorder %s24_s29, %s24_s29 }
   0x3   :  { %p1059_p0 = scmp.ne.s32.totalorder %s24_s29, %s1058_s30  ;;  %p1064_p2 = scmp.lt.s32.totalorder %s1058_s30, %s1058_s30 }
   0x5   :  { %p1065_p3 = por %p1064_p2, %p1063_p1 }
   0x7   :  { %p1066_p4 = pnand %p1065_p3, %p1059_p0 }
   0x9   :  { %1069 = shalt.err (!%p1066_p4)
}
   0xa   :  { %s1308_s9 = smov [#allocation4]   ;;  %s1309_s10 = smov [#allocation7]  }
   0xb   :  { %26 = dma.vmem_to_smem %s24_s29, 16, %s1308_s9, [#allocation6]  }
   0xc   :  { %s32_s11 = sshll.u32 %s1309_s10, 4  ;;  %s33_s11 = int_to_ptr.vmem [resolvable:$true] %s32_s11 }
   0xd   :  { %s1078_s12 = scalar_lea.vmem %s33_s11, 3072  ;;  %p1083_p6 = scmp.lt.s32.totalorder %s33_s11, %s33_s11 }
   0xe   :  { %p1079_p5 = scmp.ne.s32.totalorder %s33_s11, %s1078_s12  ;;  %p1084_p7 = scmp.lt.s32.totalorder %s1078_s12, %s1078_s12 }
  0x10   :  { %p1085_p8 = por %p1084_p7, %p1083_p6 }
  0x12   :  { %p1086_p9 = pnand %p1085_p8, %p1079_p5 }
  0x14   :  { %1089 = shalt.err (!%p1086_p9)
}
  0x15   :  { %s1310_s0 = smov 192   ;;  %s1311_s13 = smov 12  }
  0x16   :  { %38 = dma.hbm_to_vmem [thread:$0]  %s1564_s2, 3072, %s33_s11, [#allocation5], %s1310_s0, %s1310_s0, %s1311_s13  }
  0x17   :  { %s1312_s16 = smov [#allocation8]  }
  0x18   :  { %s44_s17 = sshll.u32 %s1312_s16, 4  ;;  %s45_s17 = int_to_ptr.vmem [resolvable:$true] %s44_s17 }
  0x19   :  { %s1098_s18 = scalar_lea.vmem %s45_s17, 3072  ;;  %p1103_p11 = scmp.lt.s32.totalorder %s45_s17, %s45_s17 }
  0x1a   :  { %p1099_p10 = scmp.ne.s32.totalorder %s45_s17, %s1098_s18  ;;  %p1104_p12 = scmp.lt.s32.totalorder %s1098_s18, %s1098_s18 }
  0x1c   :  { %p1105_p13 = por %p1104_p12, %p1103_p11 }
  0x1e   :  { %p1106_p0 = pnand %p1105_p13, %p1099_p10 }
  0x20   :  { %1109 = shalt.err (!%p1106_p0)
}
  0x21   :  { %50 = dma.hbm_to_vmem [thread:$0]  %s1565_s3, 3072, %s45_s17, [#allocation9], %s1310_s0, %s1310_s0, %s1311_s13  }
  0x22   :  { %1286 = dma.done.wait [#allocation6], 16  }
  0x23   :  { %1287 = vsyncadd [#allocation6], 4294967280 }
  0x24   :  { %1288 = dma.done.wait [#allocation5], 3072  }
  0x25   :  { %1289 = vsyncadd [#allocation5], 4294964224 }
  0x26   :  { %1290 = dma.done.wait [#allocation9], 3072  }
  0x27   :  { %1291 = vsyncadd [#allocation9], 4294964224 }
  0x28   :  { %66 = sfence }
  0x29   :  { %v984_v0 = vld [vmem:[#allocation8 + $0xac] ss:$12 sps:$4 sm:$0xff]   ;;  %v1313_v1 = vmov 0.0   ;;  %v986_v2 = vld [vmem:[#allocation8 + $0xb0] ss:$12 sps:$4 sm:$0xff]   ;;  %vm1314_vm0 = vmmov 0  }
  0x2a   :  { %928 = vmatprep.subr.bf16.mxu1 %v1313_v1  ;;  %944 = vmatprep.mubr.msk.bf16.mxu1 %vm1314_vm0, %v1313_v1  ;;  %v987_v3 = vld [vmem:[#allocation8 + $0xa8] ss:$12 sps:$4 sm:$0xff]   ;;  %v1315_v5 = vmov 0   ;;  %v990_v6 = vld [vmem:[#allocation8 + $0x98] ss:$12 sps:$4 sm:$0xff]   ;;  %s68_s2 = sld [smem:[#allocation4]] }
  0x2b   :  { %373 = vmatprep.subr.bf16.mxu0 %v984_v0  ;;  %929 = vmatpush3.bf16.msra.mxu1 %v986_v2  ;;  %v988_v4 = vld [vmem:[#allocation8 + $0x94] ss:$12 sps:$4 sm:$0xff]   ;;  %v991_v7 = vld [vmem:[#allocation8 + $0x90] ss:$12 sps:$4 sm:$0xff]   ;;  %v995_v10 = vld [vmem:[#allocation8 + $0x78] ss:$12 sps:$4 sm:$0xff]  }
  0x2c   :  { %405 = vmatprep.mubr.bf16.mxu0 %v1315_v5  ;;  %374 = vmatpush1.bf16.msra.mxu0 %v987_v3  ;;  %v992_v8 = vld [vmem:[#allocation8 + $0x7c] ss:$12 sps:$4 sm:$0xff]   ;;  %v994_v9 = vld [vmem:[#allocation8 + $0x80] ss:$12 sps:$4 sm:$0xff]   ;;  %v996_v11 = vld [vmem:[#allocation8 + $0x64] ss:$12 sps:$4 sm:$0xff]  }
  0x2d   :  { %930 = vmatprep.subr.bf16.mxu1 %v1313_v1  ;;  %375 = vmatprep.subr.bf16.mxu0 %v988_v4  ;;  %s1316_s3 = smov [#allocation2]   ;;  %v998_v12 = vld [vmem:[#allocation8 + $0x68] ss:$12 sps:$4 sm:$0xff]   ;;  %v999_v13 = vld [vmem:[#allocation8 + $0x60] ss:$12 sps:$4 sm:$0xff]   ;;  %s1394_s29 = scalar_lea.hbm %s1563_s1, 8064 }
  0x2e   :  { %s78_s21 = sshll.u32 %s1316_s3, 4  ;;  %v1000_v14 = vld [vmem:[#allocation8 + $0x4c] ss:$12 sps:$4 sm:$0xff]   ;;  %v1002_v15 = vld [vmem:[#allocation8 + $0x50] ss:$12 sps:$4 sm:$0xff]   ;;  %s1385_s21 = int_to_ptr.vmem [resolvable:$true] %s78_s21 }
  0x2f   :  { %931 = vmatpush3.bf16.msra.mxu1 %v990_v6  ;;  %v1003_v16 = vld [vmem:[#allocation8 + $0x48] ss:$12 sps:$4 sm:$0xff]  }
  0x30   :  { %376 = vmatpush1.bf16.msra.mxu0 %v991_v7  ;;  %932 = vmatprep.subr.bf16.mxu1 %v1313_v1  ;;  %s837_s22 = sshll.u32 %s68_s2, 4 }
  0x31   :  { %377 = vmatprep.subr.bf16.mxu0 %v992_v8  ;;  %s70_s25 = scalar_lea.hbm %s1563_s1, %s837_s22 }
  0x32   :  { %s1110_s26 = scalar_lea.hbm %s70_s25, 16  ;;  %p1113_p2 = scmp.lt.s32.totalorder %s70_s25, %s1563_s1 }
  0x33   :  { %933 = vmatpush3.bf16.msra.mxu1 %v994_v9  ;;  %p1111_p1 = scmp.ne.s32.totalorder %s70_s25, %s1110_s26  ;;  %p1114_p3 = scmp.lt.s32.totalorder %s1394_s29, %s1110_s26 }
  0x34   :  { %378 = vmatpush1.bf16.msra.mxu0 %v995_v10  ;;  %934 = vmatprep.subr.bf16.mxu1 %v1313_v1 }
  0x35   :  { %379 = vmatprep.subr.bf16.mxu0 %v996_v11  ;;  %p1115_p4 = por %p1114_p3, %p1113_p2 }
  0x37   :  { %935 = vmatpush3.bf16.msra.mxu1 %v998_v12  ;;  %p1116_p5 = pnand %p1115_p4, %p1111_p1 }
  0x38   :  { %380 = vmatpush1.bf16.msra.mxu0 %v999_v13  ;;  %936 = vmatprep.subr.bf16.mxu1 %v1313_v1 }
  0x39   :  { %1119 = shalt.err (!%p1116_p5)  }
  0x3a   :  { %s1120_s10 = scalar_lea.vmem %s1385_s21, 16  ;;  %s1403_s11 = scalar_lea.vmem %s1385_s21, 128 }
  0x3b   :  { %p1121_p6 = scmp.ne.s32.totalorder %s1385_s21, %s1120_s10  ;;  %p1125_p7 = scmp.lt.s32.totalorder %s1385_s21, %s1385_s21 }
  0x3c   :  { %p1126_p8 = scmp.lt.s32.totalorder %s1403_s11, %s1120_s10 }
  0x3e   :  { %p1127_p9 = por %p1126_p8, %p1125_p7 }
  0x40   :  { %p1128_p10 = pnand %p1127_p9, %p1121_p6 }
  0x42   :  { %1131 = shalt.err (!%p1128_p10)  }
  0x43   :  { %81 = dma.hbm_to_vmem [thread:$0]  %s70_s25, 16, %s1385_s21, [#allocation3]  ;;  %381 = vmatprep.subr.bf16.mxu0 %v1000_v14  ;;  %v1004_v17 = vld [vmem:[#allocation8 + $0x34] ss:$12 sps:$4 sm:$0xff]   ;;  %937 = vmatpush3.bf16.msra.mxu1 %v1002_v15  ;;  %v1006_v18 = vld [vmem:[#allocation8 + $0x38] ss:$12 sps:$4 sm:$0xff]  }
  0x44   :  { %382 = vmatpush1.bf16.msra.mxu0 %v1003_v16  ;;  %938 = vmatprep.subr.bf16.mxu1 %v1313_v1  ;;  %v1007_v19 = vld [vmem:[#allocation8 + $0x30] ss:$12 sps:$4 sm:$0xff]   ;;  %v1010_v21 = vld [vmem:[#allocation8 + $0x20] ss:$12 sps:$4 sm:$0xff]   ;;  %v1011_v22 = vld [vmem:[#allocation8 + $0x18] ss:$12 sps:$4 sm:$0xff]  }
  0x45   :  { %383 = vmatprep.subr.bf16.mxu0 %v1004_v17  ;;  %v1008_v20 = vld [vmem:[#allocation8 + $0x1c] ss:$12 sps:$4 sm:$0xff]   ;;  %v1012_v23 = vld [vmem:[#allocation8 + $0x4] ss:$12 sps:$4 sm:$0xff]   ;;  %v1015_v26 = vld [vmem:[#allocation8] ss:$12 sps:$4 sm:$0xff]  }
  0x46   :  { %v1014_v24 = vld [vmem:[#allocation8 + $0x8] ss:$12 sps:$4 sm:$0xff]   ;;  %v1414_v25 = vld [vmem:[%s1568_s6] sm:$0xff]  ;;  %s838_s13 = sld [smem:[#allocation4 + $0x1]]  ;;  %s1317_s19 = smov [#allocation2 + $0x1]  }
  0x47   :  { %939 = vmatpush3.bf16.msra.mxu1 %v1006_v18  ;;  %v195_v27 = vpack.c.bf16 %v1414_v25, %v1414_v25  ;;  %s840_s14 = sld [smem:[#allocation4 + $0x2]]  ;;  %s94_s20 = sshll.u32 %s1317_s19, 4  ;;  %s95_s20 = int_to_ptr.vmem [resolvable:$true] %s94_s20 }
  0x48   :  { %384 = vmatpush1.bf16.msra.mxu0 %v1007_v19  ;;  %940 = vmatprep.subr.bf16.mxu1 %v1313_v1  ;;  %s1419_s15 = sld [smem:[#allocation4 + $0x3]] }
  0x49   :  { %385 = vmatprep.subr.bf16.mxu0 %v1008_v20  ;;  %s1421_s16 = sld [smem:[#allocation4 + $0x4]] }
  0x4a   :  { %s1423_s6 = sld [smem:[#allocation4 + $0x5]] }
  0x4b   :  { %941 = vmatpush3.bf16.msra.mxu1 %v1010_v21  ;;  %s1425_s17 = sld [smem:[#allocation4 + $0x6]] }
  0x4c   :  { %386 = vmatpush1.bf16.msra.mxu0 %v1011_v22  ;;  %942 = vmatprep.subr.bf16.mxu1 %v1313_v1  ;;  %s839_s18 = sshll.u32 %s838_s13, 4 }
  0x4d   :  { %387 = vmatprep.subr.bf16.mxu0 %v1012_v23  ;;  %s84_s22 = scalar_lea.hbm %s1563_s1, %s839_s18 }
  0x4e   :  { %s1132_s23 = scalar_lea.hbm %s84_s22, 16  ;;  %p1135_p12 = scmp.lt.s32.totalorder %s84_s22, %s1563_s1 }
  0x4f   :  { %943 = vmatpush3.bf16.msra.mxu1 %v1014_v24  ;;  %p1133_p11 = scmp.ne.s32.totalorder %s84_s22, %s1132_s23  ;;  %p1136_p13 = scmp.lt.s32.totalorder %s1394_s29, %s1132_s23 }
  0x50   :  { %388 = vmatpush1.bf16.msra.mxu0 %v1015_v26 }
  0x51   :  { %p1137_p0 = por %p1136_p13, %p1135_p12 }
  0x52   :  { %945 = vmatmul.mubr.bf16.vlgmr.msra.gmra.mxu1 %v195_v27 }
  0x53   :  { %406 = vmatmul.mubr.bf16.vlgmr.msra.gmra.mxu0 %v195_v27  ;;  %p1138_p1 = pnand %p1137_p0, %p1133_p11 }
  0x55   :  { %1141 = shalt.err (!%p1138_p1)  }
  0x56   :  { %s1142_s26 = scalar_lea.vmem %s95_s20, 16  ;;  %p1147_p3 = scmp.lt.s32.totalorder %s95_s20, %s1385_s21 }
  0x57   :  { %p1143_p2 = scmp.ne.s32.totalorder %s95_s20, %s1142_s26  ;;  %p1148_p4 = scmp.lt.s32.totalorder %s1403_s11, %s1142_s26 }
  0x59   :  { %p1149_p5 = por %p1148_p4, %p1147_p3 }
  0x5b   :  { %p1150_p6 = pnand %p1149_p5, %p1143_p2 }
  0x5d   :  { %1153 = shalt.err (!%p1150_p6)  }
  0x5e   :  { %97 = dma.hbm_to_vmem [thread:$0]  %s84_s22, 16, %s95_s20, [#allocation3 + $0x1] }
  0x5f   :  { %s841_s27 = sshll.u32 %s840_s14, 4  ;;  %s1318_s10 = smov [#allocation2 + $0x2]  }
  0x60   :  { %s100_s9 = scalar_lea.hbm %s1563_s1, %s841_s27  ;;  %s110_s12 = sshll.u32 %s1318_s10, 4  ;;  %s111_s12 = int_to_ptr.vmem [resolvable:$true] %s110_s12 }
  0x61   :  { %s843_s0 = sshll.u32 %s1419_s15, 4  ;;  %s1154_s13 = scalar_lea.hbm %s100_s9, 16 }
  0x62   :  { %p1155_p7 = scmp.ne.s32.totalorder %s100_s9, %s1154_s13  ;;  %p1157_p8 = scmp.lt.s32.totalorder %s100_s9, %s1563_s1 }
  0x63   :  { %p1158_p9 = scmp.lt.s32.totalorder %s1394_s29, %s1154_s13 }
  0x65   :  { %p1159_p10 = por %p1158_p9, %p1157_p8 }
  0x67   :  { %p1160_p11 = pnand %p1159_p10, %p1155_p7 }
  0x69   :  { %1163 = shalt.err (!%p1160_p11)  }
  0x6a   :  { %s1164_s20 = scalar_lea.vmem %s111_s12, 16  ;;  %p1169_p13 = scmp.lt.s32.totalorder %s111_s12, %s1385_s21 }
  0x6b   :  { %p1165_p12 = scmp.ne.s32.totalorder %s111_s12, %s1164_s20  ;;  %p1170_p0 = scmp.lt.s32.totalorder %s1403_s11, %s1164_s20 }
  0x6d   :  { %p1171_p1 = por %p1170_p0, %p1169_p13 }
  0x6f   :  { %p1172_p2 = pnand %p1171_p1, %p1165_p12 }
  0x71   :  { %1175 = shalt.err (!%p1172_p2)  }
  0x72   :  { %113 = dma.hbm_to_vmem [thread:$0]  %s100_s9, 16, %s111_s12, [#allocation3 + $0x2] }
  0x73   :  { %s116_s2 = scalar_lea.hbm %s1563_s1, %s843_s0  ;;  %s1319_s3 = smov [#allocation2 + $0x3]  }
  0x74   :  { %s126_s22 = sshll.u32 %s1319_s3, 4  ;;  %s845_s23 = sshll.u32 %s1421_s16, 4  ;;  %s127_s22 = int_to_ptr.vmem [resolvable:$true] %s126_s22 }
  0x75   :  { %s1453_s26 = scalar_lea.hbm %s1563_s1, %s845_s23  ;;  %s1176_s27 = scalar_lea.hbm %s116_s2, 16 }
  0x76   :  { %p1177_p3 = scmp.ne.s32.totalorder %s116_s2, %s1176_s27  ;;  %p1179_p4 = scmp.lt.s32.totalorder %s116_s2, %s1563_s1 }
  0x77   :  { %p1180_p5 = scmp.lt.s32.totalorder %s1394_s29, %s1176_s27 }
  0x79   :  { %p1181_p6 = por %p1180_p5, %p1179_p4 }
  0x7b   :  { %p1182_p7 = pnand %p1181_p6, %p1177_p3 }
  0x7d   :  { %1185 = shalt.err (!%p1182_p7)  }
  0x7e   :  { %s1186_s9 = scalar_lea.vmem %s127_s22, 16  ;;  %p1191_p9 = scmp.lt.s32.totalorder %s127_s22, %s1385_s21 }
  0x7f   :  { %p1187_p8 = scmp.ne.s32.totalorder %s127_s22, %s1186_s9  ;;  %p1192_p10 = scmp.lt.s32.totalorder %s1403_s11, %s1186_s9 }
  0x81   :  { %p1193_p11 = por %p1192_p10, %p1191_p9 }
  0x83   :  { %p1194_p12 = pnand %p1193_p11, %p1187_p8 }
  0x85   :  { %1197 = shalt.err (!%p1194_p12)  }
  0x86   :  { %129 = dma.hbm_to_vmem [thread:$0]  %s116_s2, 16, %s127_s22, [#allocation3 + $0x3] }
  0x87   :  { %s847_s16 = sshll.u32 %s1423_s6, 4  ;;  %s1320_s10 = smov [#allocation2 + $0x4]  }
  0x88   :  { %s142_s12 = sshll.u32 %s1320_s10, 4  ;;  %s1465_s18 = scalar_lea.hbm %s1563_s1, %s847_s16  ;;  %s143_s12 = int_to_ptr.vmem [resolvable:$true] %s142_s12 }
  0x89   :  { %s1198_s19 = scalar_lea.hbm %s1453_s26, 16  ;;  %p1201_p0 = scmp.lt.s32.totalorder %s1453_s26, %s1563_s1 }
  0x8a   :  { %p1199_p13 = scmp.ne.s32.totalorder %s1453_s26, %s1198_s19  ;;  %p1202_p1 = scmp.lt.s32.totalorder %s1394_s29, %s1198_s19 }
  0x8c   :  { %p1203_p2 = por %p1202_p1, %p1201_p0 }
  0x8e   :  { %p1204_p3 = pnand %p1203_p2, %p1199_p13 }
  0x90   :  { %1207 = shalt.err (!%p1204_p3)  }
  0x91   :  { %s1208_s15 = scalar_lea.vmem %s143_s12, 16  ;;  %p1213_p5 = scmp.lt.s32.totalorder %s143_s12, %s1385_s21 }
  0x92   :  { %p1209_p4 = scmp.ne.s32.totalorder %s143_s12, %s1208_s15  ;;  %p1214_p6 = scmp.lt.s32.totalorder %s1403_s11, %s1208_s15 }
  0x94   :  { %p1215_p7 = por %p1214_p6, %p1213_p5 }
  0x96   :  { %p1216_p8 = pnand %p1215_p7, %p1209_p4 }
  0x98   :  { %1219 = shalt.err (!%p1216_p8)  }
  0x99   :  { %145 = dma.hbm_to_vmem [thread:$0]  %s1453_s26, 16, %s143_s12, [#allocation3 + $0x4] }
  0x9a   :  { %s1321_s6 = smov [#allocation2 + $0x5]   ;;  %s849_s3 = sshll.u32 %s1425_s17, 4 }
  0x9b   :  { %s158_s2 = sshll.u32 %s1321_s6, 4  ;;  %s1481_s24 = scalar_lea.hbm %s1563_s1, %s849_s3  ;;  %s159_s2 = int_to_ptr.vmem [resolvable:$true] %s158_s2 }
  0x9c   :  { %s1220_s25 = scalar_lea.hbm %s1465_s18, 16  ;;  %p1223_p10 = scmp.lt.s32.totalorder %s1465_s18, %s1563_s1 }
  0x9d   :  { %p1221_p9 = scmp.ne.s32.totalorder %s1465_s18, %s1220_s25  ;;  %p1224_p11 = scmp.lt.s32.totalorder %s1394_s29, %s1220_s25 }
  0x9f   :  { %p1225_p12 = por %p1224_p11, %p1223_p10 }
  0xa1   :  { %p1226_p13 = pnand %p1225_p12, %p1221_p9 }
  0xa3   :  { %1229 = shalt.err (!%p1226_p13)  }
  0xa4   :  { %s1230_s26 = scalar_lea.vmem %s159_s2, 16  ;;  %p1235_p1 = scmp.lt.s32.totalorder %s159_s2, %s1385_s21 }
  0xa5   :  { %p1231_p0 = scmp.ne.s32.totalorder %s159_s2, %s1230_s26  ;;  %p1236_p2 = scmp.lt.s32.totalorder %s1403_s11, %s1230_s26 }
  0xa7   :  { %p1237_p3 = por %p1236_p2, %p1235_p1 }
  0xa9   :  { %p1238_p4 = pnand %p1237_p3, %p1231_p0 }
  0xab   :  { %1241 = shalt.err (!%p1238_p4)  }
  0xac   :  { %161 = dma.hbm_to_vmem [thread:$0]  %s1465_s18, 16, %s159_s2, [#allocation3 + $0x5] }
  0xad   :  { %s850_s17 = sld [smem:[#allocation4 + $0x7]]  ;;  %s1322_s30 = smov [#allocation2 + $0x6]  }
  0xae   :  { %s174_s9 = sshll.u32 %s1322_s30, 4  ;;  %s1323_s16 = smov [#allocation2 + $0x7]   ;;  %s175_s9 = int_to_ptr.vmem [resolvable:$true] %s174_s9 }
  0xaf   :  { %s190_s10 = sshll.u32 %s1323_s16, 4  ;;  %s1242_s12 = scalar_lea.hbm %s1481_s24, 16  ;;  %s191_s10 = int_to_ptr.vmem [resolvable:$true] %s190_s10 }
  0xb0   :  { %p1243_p5 = scmp.ne.s32.totalorder %s1481_s24, %s1242_s12  ;;  %p1245_p6 = scmp.lt.s32.totalorder %s1481_s24, %s1563_s1 }
  0xb1   :  { %p1246_p7 = scmp.lt.s32.totalorder %s1394_s29, %s1242_s12 }
  0xb3   :  { %p1247_p8 = por %p1246_p7, %p1245_p6 }
  0xb5   :  { %p1248_p9 = pnand %p1247_p8, %p1243_p5 }
  0xb7   :  { %1251 = shalt.err (!%p1248_p9)  }
  0xb8   :  { %s1252_s19 = scalar_lea.vmem %s175_s9, 16  ;;  %p1257_p11 = scmp.lt.s32.totalorder %s175_s9, %s1385_s21 }
  0xb9   :  { %p1253_p10 = scmp.ne.s32.totalorder %s175_s9, %s1252_s19  ;;  %p1258_p12 = scmp.lt.s32.totalorder %s1403_s11, %s1252_s19 }
  0xbb   :  { %p1259_p13 = por %p1258_p12, %p1257_p11 }
  0xbd   :  { %p1260_p0 = pnand %p1259_p13, %p1253_p10 }
  0xbf   :  { %1263 = shalt.err (!%p1260_p0)  }
  0xc0   :  { %177 = dma.hbm_to_vmem [thread:$0]  %s1481_s24, 16, %s175_s9, [#allocation3 + $0x6] }
  0xc1   :  { %s851_s18 = sshll.u32 %s850_s17, 4 }
  0xc2   :  { %s180_s15 = scalar_lea.hbm %s1563_s1, %s851_s18 }
  0xc3   :  { %s1264_s6 = scalar_lea.hbm %s180_s15, 16  ;;  %p1267_p2 = scmp.lt.s32.totalorder %s180_s15, %s1563_s1 }
  0xc4   :  { %p1265_p1 = scmp.ne.s32.totalorder %s180_s15, %s1264_s6  ;;  %p1268_p3 = scmp.lt.s32.totalorder %s1394_s29, %s1264_s6 }
  0xc6   :  { %p1269_p4 = por %p1268_p3, %p1267_p2 }
  0xc8   :  { %p1270_p5 = pnand %p1269_p4, %p1265_p1 }
  0xca   :  { %1273 = shalt.err (!%p1270_p5)  }
  0xcb   :  { %s1274_s22 = scalar_lea.vmem %s191_s10, 16  ;;  %p1279_p7 = scmp.lt.s32.totalorder %s191_s10, %s1385_s21 }
  0xcc   :  { %p1275_p6 = scmp.ne.s32.totalorder %s191_s10, %s1274_s22  ;;  %p1280_p8 = scmp.lt.s32.totalorder %s1403_s11, %s1274_s22 }
  0xce   :  { %p1281_p9 = por %p1280_p8, %p1279_p7 }
  0xd0   :  { %p1282_p10 = pnand %p1281_p9, %p1275_p6 }
  0xd2   :  { %1285 = shalt.err (!%p1282_p10)  }
  0xd3   :  { %193 = dma.hbm_to_vmem [thread:$0]  %s180_s15, 16, %s191_s10, [#allocation3 + $0x7]  ;;  %v230_v28 = vlaneseq  ;;  %v228_v31 = vld [vmem:[%s1567_s5] sm:$0x7] }
  0xd5   :  { %v1512_v29 = vshrl.u32 %v230_v28, 7 }
  0xd7   :  { %v240_v30 = vsub.s32 2, %v1512_v29  ;;  %v232_v32 = vsub.s32 0, %v1512_v29  ;;  %v236_v33 = vsub.s32 1, %v1512_v29 }
  0xd9   :  { %v241_v34 = vrot.slane %v228_v31, %v240_v30  ;;  %v233_v35 = vrot.slane %v228_v31, %v232_v32  ;;  %v237_v37 = vrot.slane %v228_v31, %v236_v33 }
 0x112   :  { %v448_v36 = vpop.f32.mrf.mxu1 }
 0x113   :  { %v1526_v38 = vadd.f32 %v448_v36, %v241_v34  ;;  %v407_v39 = vpop.f32.mrf.mxu0 }
 0x114   :  { %v1528_v40 = vadd.f32 %v407_v39, %v233_v35  ;;  %v946_v41 = vpop.f32.mrf.mxu1 }
 0x115   :  { %v409_v42 = vpop.f32.mrf.mxu0 }
 0x116   :  { %v1530_v43 = vadd.f32 %v409_v42, %v237_v37  ;;  %v451_v44 = vpop.f32.mrf.mxu1 }
 0x117   :  { %v411_v45 = vpop.f32.mrf.mxu0 }
 0x118   :  { %v947_v46 = vpop.f32.mrf.mxu1 }
 0x119   :  { %v412_v47 = vpop.f32.mrf.mxu0 }
 0x11a   :  { %1292 = dma.done.wait [#allocation3], 16 }
 0x11b   :  { %1293 = vsyncadd [#allocation3], 4294967280 }
 0x11c   :  { %1294 = dma.done.wait [#allocation3 + $0x1], 16 }
 0x11d   :  { %1295 = vsyncadd [#allocation3 + $0x1], 4294967280 }
 0x11e   :  { %1296 = dma.done.wait [#allocation3 + $0x2], 16 }
 0x11f   :  { %1297 = vsyncadd [#allocation3 + $0x2], 4294967280 }
 0x120   :  { %1298 = dma.done.wait [#allocation3 + $0x3], 16 }
 0x121   :  { %1299 = vsyncadd [#allocation3 + $0x3], 4294967280 }
 0x122   :  { %1300 = dma.done.wait [#allocation3 + $0x4], 16 }
 0x123   :  { %1301 = vsyncadd [#allocation3 + $0x4], 4294967280 }
 0x124   :  { %1302 = dma.done.wait [#allocation3 + $0x5], 16 }
 0x125   :  { %1303 = vsyncadd [#allocation3 + $0x5], 4294967280 }
 0x126   :  { %1304 = dma.done.wait [#allocation3 + $0x6], 16 }
 0x127   :  { %1305 = vsyncadd [#allocation3 + $0x6], 4294967280 }
 0x128   :  { %1306 = dma.done.wait [#allocation3 + $0x7], 16 }
 0x129   :  { %1307 = vsyncadd [#allocation3 + $0x7], 4294967280  ;;  %948 = vmatprep.subr.bf16.mxu1 %v1313_v1  ;;  %682 = vmatprep.mubr.bf16.mxu0 %v1315_v5  ;;  %v1016_v48 = vld [vmem:[#allocation7 + $0xac] ss:$12 sps:$4 sm:$0xff]   ;;  %v1018_v49 = vld [vmem:[#allocation7 + $0xa8] ss:$12 sps:$4 sm:$0xff]  }
 0x12a   :  { %964 = vmatprep.mubr.msk.bf16.mxu1 %vm1314_vm0, %v1313_v1  ;;  %650 = vmatprep.subr.bf16.mxu0 %v1016_v48  ;;  %v1019_v50 = vld [vmem:[#allocation7 + $0x94] ss:$12 sps:$4 sm:$0xff]   ;;  %v1021_v51 = vld [vmem:[#allocation7 + $0x90] ss:$12 sps:$4 sm:$0xff]   ;;  %v1024_v53 = vld [vmem:[#allocation7 + $0x78] ss:$12 sps:$4 sm:$0xff]  }
 0x12b   :  { %651 = vmatpush1.bf16.msra.mxu0 %v1018_v49  ;;  %v1022_v52 = vld [vmem:[#allocation7 + $0x7c] ss:$12 sps:$4 sm:$0xff]   ;;  %v1025_v54 = vld [vmem:[#allocation7 + $0x64] ss:$12 sps:$4 sm:$0xff]   ;;  %v1027_v55 = vld [vmem:[#allocation7 + $0x60] ss:$12 sps:$4 sm:$0xff]  }
 0x12c   :  { %652 = vmatprep.subr.bf16.mxu0 %v1019_v50  ;;  %v1040_v56 = vld [vmem:[#allocation7 + $0xb0] ss:$12 sps:$4 sm:$0xff]   ;;  %v1028_v57 = vld [vmem:[#allocation7 + $0x4c] ss:$12 sps:$4 sm:$0xff]   ;;  %v1030_v59 = vld [vmem:[#allocation7 + $0x48] ss:$12 sps:$4 sm:$0xff]  }
 0x12d   :  { %949 = vmatpush3.bf16.msra.mxu1 %v1040_v56  ;;  %v1041_v58 = vld [vmem:[#allocation7 + $0x98] ss:$12 sps:$4 sm:$0xff]   ;;  %v1031_v60 = vld [vmem:[#allocation7 + $0x34] ss:$12 sps:$4 sm:$0xff]   ;;  %v1033_v62 = vld [vmem:[#allocation7 + $0x30] ss:$12 sps:$4 sm:$0xff]  }
 0x12e   :  { %950 = vmatprep.subr.bf16.mxu1 %v1313_v1  ;;  %v1042_v61 = vld [vmem:[#allocation7 + $0x80] ss:$12 sps:$4 sm:$0xff]   ;;  %v1034_v63 = vld [vmem:[#allocation7 + $0x1c] ss:$12 sps:$4 sm:$0xff]   ;;  %v1036_v2 = vld [vmem:[#allocation7 + $0x18] ss:$12 sps:$4 sm:$0xff]  }
 0x12f   :  { %653 = vmatpush1.bf16.msra.mxu0 %v1021_v51  ;;  %v1043_v0 = vld [vmem:[#allocation7 + $0x68] ss:$12 sps:$4 sm:$0xff]   ;;  %v1037_v3 = vld [vmem:[#allocation7 + $0x4] ss:$12 sps:$4 sm:$0xff]   ;;  %v1039_v5 = vld [vmem:[#allocation7] ss:$12 sps:$4 sm:$0xff]  }
 0x130   :  { %654 = vmatprep.subr.bf16.mxu0 %v1022_v52  ;;  %v1044_v4 = vld [vmem:[#allocation7 + $0x50] ss:$12 sps:$4 sm:$0xff]   ;;  %v1045_v7 = vld [vmem:[#allocation7 + $0x38] ss:$12 sps:$4 sm:$0xff]   ;;  %v1046_v9 = vld [vmem:[#allocation7 + $0x20] ss:$12 sps:$4 sm:$0xff]  }
 0x131   :  { %951 = vmatpush3.bf16.msra.mxu1 %v1041_v58  ;;  %v471_v6 = vld [vmem:[#allocation2] sm:$0xff]  ;;  %v1047_v10 = vld [vmem:[#allocation7 + $0x8] ss:$12 sps:$4 sm:$0xff]  }
 0x132   :  { %952 = vmatprep.subr.bf16.mxu1 %v1313_v1  ;;  %v472_v8 = vpack.c.bf16 %v471_v6, %v471_v6  ;;  %v505_v11 = vld [vmem:[%s1566_s4] sm:$0x7] }
 0x133   :  { %655 = vmatpush1.bf16.msra.mxu0 %v1024_v53  ;;  %v510_v12 = vrot.slane %v505_v11, %v232_v32  ;;  %v514_v15 = vrot.slane %v505_v11, %v236_v33  ;;  %v518_v33 = vrot.slane %v505_v11, %v240_v30 }
 0x134   :  { %656 = vmatprep.subr.bf16.mxu0 %v1025_v54 }
 0x135   :  { %953 = vmatpush3.bf16.msra.mxu1 %v1042_v61 }
 0x136   :  { %954 = vmatprep.subr.bf16.mxu1 %v1313_v1 }
 0x137   :  { %657 = vmatpush1.bf16.msra.mxu0 %v1027_v55 }
 0x138   :  { %658 = vmatprep.subr.bf16.mxu0 %v1028_v57 }
 0x139   :  { %955 = vmatpush3.bf16.msra.mxu1 %v1043_v0 }
 0x13a   :  { %956 = vmatprep.subr.bf16.mxu1 %v1313_v1 }
 0x13b   :  { %659 = vmatpush1.bf16.msra.mxu0 %v1030_v59 }
 0x13c   :  { %660 = vmatprep.subr.bf16.mxu0 %v1031_v60 }
 0x13d   :  { %957 = vmatpush3.bf16.msra.mxu1 %v1044_v4 }
 0x13e   :  { %958 = vmatprep.subr.bf16.mxu1 %v1313_v1 }
 0x13f   :  { %661 = vmatpush1.bf16.msra.mxu0 %v1033_v62 }
 0x140   :  { %662 = vmatprep.subr.bf16.mxu0 %v1034_v63 }
 0x141   :  { %959 = vmatpush3.bf16.msra.mxu1 %v1045_v7 }
 0x142   :  { %960 = vmatprep.subr.bf16.mxu1 %v1313_v1 }
 0x143   :  { %663 = vmatpush1.bf16.msra.mxu0 %v1036_v2 }
 0x144   :  { %664 = vmatprep.subr.bf16.mxu0 %v1037_v3 }
 0x145   :  { %961 = vmatpush3.bf16.msra.mxu1 %v1046_v9 }
 0x146   :  { %962 = vmatprep.subr.bf16.mxu1 %v1313_v1 }
 0x147   :  { %665 = vmatpush1.bf16.msra.mxu0 %v1039_v5 }
 0x149   :  { %963 = vmatpush3.bf16.msra.mxu1 %v1047_v10 }
 0x14a   :  { %683 = vmatmul.mubr.bf16.vlgmr.msra.gmra.mxu0 %v472_v8 }
 0x14c   :  { %965 = vmatmul.mubr.bf16.vlgmr.msra.gmra.mxu1 %v472_v8 }
 0x20a   :  { %v684_v13 = vpop.f32.mrf.mxu0 }
 0x20b   :  { %v685_v14 = vadd.f32 %v684_v13, %v510_v12 }
 0x20c   :  { %v686_v16 = vpop.f32.mrf.mxu0  ;;  %v725_v22 = vpop.f32.mrf.mxu1 }
 0x20d   :  { %v731_v17 = vadd.f32 %v685_v14, %v1528_v40  ;;  %v687_v1 = vadd.f32 %v686_v16, %v514_v15  ;;  %v726_v35 = vadd.f32 %v725_v22, %v518_v33 }
 0x20e   :  { %v688_v18 = vpop.f32.mrf.mxu0  ;;  %v966_v23 = vpop.f32.mrf.mxu1 }
 0x20f   :  { %v900_v19 = vmul.f32 -1.442695, %v731_v17  ;;  %v738_v21 = vadd.f32 %v687_v1, %v1530_v43 }
 0x210   :  { %v689_v20 = vpop.f32.mrf.mxu0  ;;  %v728_v26 = vpop.f32.mrf.mxu1 }
 0x211   :  { %1048 = vpow2.f32 %v900_v19  ;;  %v901_v24 = vmul.f32 -1.442695, %v738_v21 }
 0x212   :  { %v967_v27 = vpop.f32.mrf.mxu1 }
 0x213   :  { %1050 = vpow2.f32 %v901_v24 }
 0x21e   :  { %v1049_v28 = vpop.eup %1048 }
 0x21f   :  { %v735_v31 = vadd.f32 1.0, %v1049_v28 }
 0x220   :  { %v1051_v32 = vpop.eup %1050 }
 0x221   :  { %1052 = vrcp.f32 %v735_v31  ;;  %v742_v34 = vadd.f32 1.0, %v1051_v32 }
 0x223   :  { %1054 = vrcp.f32 %v742_v34 }
 0x22e   :  { %v1053_v36 = vpop.eup %1052 }
 0x22f   :  { %v745_v37 = vmul.f32 %v1053_v36, %v1526_v38 }
 0x230   :  { %v1055_v40 = vpop.eup %1054 }
 0x231   :  { %v746_v39 = vadd.f32 %v745_v37, %v726_v35  ;;  %v748_v41 = vsub.f32 1.0, %v1055_v40  ;;  %v750_v43 = vmul.f32 %v1055_v40, %v1414_v25 }
 0x233   :  { %1056 = vtanh.f32 %v746_v39 }
 0x240   :  { %v1057_v42 = vpop.eup %1056 }
 0x241   :  { %v749_v44 = vmul.f32 %v1057_v42, %v748_v41 }
 0x243   :  { %v751_v45 = vadd.f32 %v750_v43, %v749_v44 }
 0x245   :  { %752 = vst [vmem:[%s1569_s7] sm:$0xff] %v751_v45  ;;  %v753_v29 = vpack.c.bf16 %v751_v45, %v751_v45 }
 0x247   :  { %754 = vst [vmem:[%s1570_s8] sm:$0xf] %v753_v29 }
 0x248   :  { %763 = vsyncpa [#allocation5], 1 }
 0x249   :  { %764 = vsyncpa [#allocation9], 1 }
 0x24a   :  { %765 = vsyncpa [#allocation6], 1 }
 0x24b   :  { %766 = vsyncmov [#allocation3] }
 0x24e   :  { %s767_s25 = vpop.sfrf %766 }
 0x24f   :  { %p902_p11 = scmp.ne.s32.totalorder %s767_s25, 0 }
 0x251   :  { %771 = shalt.err (%p902_p11)  }
 0x252   :  { %773 = vsyncmov [#allocation3 + $0x1] }
 0x255   :  { %s774_s27 = vpop.sfrf %773 }
 0x256   :  { %p903_p12 = scmp.ne.s32.totalorder %s774_s27, 0 }
 0x258   :  { %778 = shalt.err (%p903_p12)  }
 0x259   :  { %780 = vsyncmov [#allocation3 + $0x2] }
 0x25c   :  { %s781_s28 = vpop.sfrf %780 }
 0x25d   :  { %p904_p13 = scmp.ne.s32.totalorder %s781_s28, 0 }
 0x25f   :  { %785 = shalt.err (%p904_p13)  }
 0x260   :  { %787 = vsyncmov [#allocation3 + $0x3] }
 0x263   :  { %s788_s7 = vpop.sfrf %787 }
 0x264   :  { %p905_p0 = scmp.ne.s32.totalorder %s788_s7, 0 }
 0x266   :  { %792 = shalt.err (%p905_p0)  }
 0x267   :  { %794 = vsyncmov [#allocation3 + $0x4] }
 0x26a   :  { %s795_s8 = vpop.sfrf %794 }
 0x26b   :  { %p906_p1 = scmp.ne.s32.totalorder %s795_s8, 0 }
 0x26d   :  { %799 = shalt.err (%p906_p1)  }
 0x26e   :  { %801 = vsyncmov [#allocation3 + $0x5] }
 0x271   :  { %s802_s26 = vpop.sfrf %801 }
 0x272   :  { %p907_p2 = scmp.ne.s32.totalorder %s802_s26, 0 }
 0x274   :  { %806 = shalt.err (%p907_p2)  }
 0x275   :  { %808 = vsyncmov [#allocation3 + $0x6] }
 0x278   :  { %s809_s17 = vpop.sfrf %808 }
 0x279   :  { %p908_p3 = scmp.ne.s32.totalorder %s809_s17, 0 }
 0x27b   :  { %813 = shalt.err (%p908_p3)  }
 0x27c   :  { %815 = vsyncmov [#allocation3 + $0x7] }
 0x27f   :  { %s816_s30 = vpop.sfrf %815 }
 0x280   :  { %p909_p4 = scmp.ne.s32.totalorder %s816_s30, 0 }
 0x282   :  { %820 = shalt.err (%p909_p4)  }

</bundles_post_ra>
